<compile_context>
chip_gen: v7x
topology: tpu7x:2x2x1
jax: 0.10.0
libtpu: 0.0.40
codegen_flags: <defaults>
</compile_context>

<pallas_src>
import functools

import jax
import jax.numpy as jnp
from jax.experimental import pallas as pl
from jax.experimental.pallas import tpu as pltpu


def anfis_kernel(x_ref, mu_ref, nw_ref, seq_ref, out_ref, *,
                 n_inputs, n_rules, n_outputs, chunk):
    """One batch tile.

    x_ref:   (NI, TBS, 128) VMEM f32  -- x^T, batch spread over (sublane, lane)
    mu_ref:  (NR, NI)       SMEM f32
    nw_ref:  (NR, NI)       SMEM f32  -- precomputed -1 / (2 * sigma^2)
    seq_ref: (NR, NO)       SMEM f32
    out_ref: (NO, TBS, 128) VMEM f32
    """
    tbs = x_ref.shape[1]

    def process(start, size):
        # Load the NI feature rows of this sub-chunk once: dense (size, 128) slabs.
        xs = [x_ref[i, pl.ds(start, size), :] for i in range(n_inputs)]
        denom = None
        outs = [None] * n_outputs
        for r in range(n_rules):
            zmin = None
            for i in range(n_inputs):
                d = xs[i] - mu_ref[r, i]            # SMEM scalar broadcast (free)
                z = (d * d) * nw_ref[r, i]          # == -(x-mu)^2 / (2*sigma^2)
                zmin = z if zmin is None else jnp.minimum(zmin, z)
            # min_i exp(z_i) == exp(min_i z_i): one transcendental per (rule, row).
            a = jnp.exp(zmin)                       # (size, 128) rule activation
            denom = a if denom is None else denom + a
            for o in range(n_outputs):
                t = a * seq_ref[r, o]               # SMEM scalar broadcast
                outs[o] = t if outs[o] is None else outs[o] + t
        # out[b,o] = (sum_r act*seq[r,o]) / clamp(sum_r act, 1e-12, 1e12)
        inv = pl.reciprocal(jnp.clip(denom, 1e-12, 1e12), approx=False)
        for o in range(n_outputs):
            out_ref[o, pl.ds(start, size), :] = outs[o] * inv

    n_full, rem = divmod(tbs, chunk)
    if n_full == 1 and rem == 0:
        process(0, chunk)                           # single static chunk (small tiles)
    else:
        if n_full > 0:
            @pl.loop(0, n_full)
            def _(c):
                start = c * chunk
                if chunk % 8 == 0:
                    start = pl.multiple_of(start, 8)
                process(start, chunk)
        if rem > 0:
            process(n_full * chunk, rem)            # static ragged tail of the tile


def _batch_tiling(n_rows, batch_tile):
    """Pick (tile height in 128-wide lane-rows, number of grid tiles)."""
    n_lr = -(-n_rows // 128)                        # lane-rows needed (ceil)
    if n_lr <= 8:
        return n_lr, 1                              # one tiny tile (block == full dims)
    want = max(8, batch_tile // 128)
    tbs = min(want, -(-n_lr // 8) * 8)
    if tbs >= n_lr and n_lr >= 16:
        # Split into >=2 tiles so the "parallel" batch axis can use both v7x cores.
        tbs = max(8, (n_lr // 2 + 7) // 8 * 8)
    n_tiles = -(-n_lr // tbs)
    if n_tiles == 1:
        return n_lr, 1
    # Rebalance to minimize padding while keeping a multiple of 8 lane-rows per tile.
    tbs = max(8, (-(-n_lr // n_tiles) + 7) // 8 * 8)
    n_tiles = -(-n_lr // tbs)
    return tbs, n_tiles


@functools.partial(jax.jit, static_argnames=("batch_tile",))
def anfis_forward(x, mu, sigma, seq, *, batch_tile=8192):
    """x: (B, n_inputs); mu/sigma: (n_rules, n_inputs) (leading 1 tolerated);
    seq: (n_rules, n_outputs).  Returns (B, n_outputs)."""
    # TODO(synk): the optional sklearn `scaler.transform(x)` preprocessing in the
    # PyTorch module is host-side (None by default) and is not translated.
    x = jnp.asarray(x, jnp.float32)
    seq = jnp.asarray(seq, jnp.float32)
    n_rules, n_outputs = seq.shape
    batch, n_inputs = x.shape
    mu = jnp.asarray(mu, jnp.float32).reshape(n_rules, n_inputs)
    sigma = jnp.asarray(sigma, jnp.float32).reshape(n_rules, n_inputs)

    # Precompute the NEGATIVE inverse variance once on the (NR, NI) parameters.
    neg_w = -1.0 / (2.0 * sigma * sigma)

    tbs, n_tiles = _batch_tiling(batch, batch_tile)
    padded = n_tiles * tbs * 128

    # Feature-major layout with the batch spread over (sublane, lane).  Under jit the
    # transpose + pad + reshape fuse into a single relayout pass in front of the kernel.
    xt = x.T
    if padded != batch:
        xt = jnp.pad(xt, ((0, 0), (0, padded - batch)))
    x3 = xt.reshape(n_inputs, padded // 128, 128)

    chunk = min(16, tbs)   # 16 lane-rows = 2048 batch rows per inner step (low vreg pressure)

    out3 = pl.pallas_call(
        functools.partial(anfis_kernel, n_inputs=n_inputs, n_rules=n_rules,
                          n_outputs=n_outputs, chunk=chunk),
        out_shape=jax.ShapeDtypeStruct((n_outputs, padded // 128, 128), jnp.float32),
        grid=(n_tiles,),
        in_specs=[
            pl.BlockSpec((n_inputs, tbs, 128), lambda t: (0, t, 0)),     # x^T tiles
            pl.BlockSpec(memory_space=pltpu.MemorySpace.SMEM),           # mu
            pl.BlockSpec(memory_space=pltpu.MemorySpace.SMEM),           # -1/(2*sigma^2)
            pl.BlockSpec(memory_space=pltpu.MemorySpace.SMEM),           # seq
        ],
        out_specs=pl.BlockSpec((n_outputs, tbs, 128), lambda t: (0, t, 0)),
        compiler_params=pltpu.CompilerParams(dimension_semantics=("parallel",)),
    )(x3, mu, neg_w, seq)

    out = out3.reshape(n_outputs, padded).T          # (padded, NO), batch-major again
    return out[:batch]


def anfis_reference(x, mu, sigma, seq):
    """Pure-JAX reference mirroring the PyTorch forward exactly."""
    n_rules = seq.shape[0]
    mu = mu.reshape(n_rules, x.shape[1])
    sigma = sigma.reshape(n_rules, x.shape[1])
    d = x[:, None, :] - mu[None, :, :]
    memb = jnp.exp(-(d * d) / (2.0 * sigma[None, :, :] ** 2))
    act = jnp.min(memb, axis=-1)
    denom = jnp.clip(jnp.sum(act, axis=1, keepdims=True), 1e-12, 1e12)
    return (act / denom) @ seq


if __name__ == "__main__":
    B, N_INPUTS, N_RULES, N_OUTPUTS = 8, 4, 16, 4

    key = jax.random.PRNGKey(0)
    kx, kmu, ksig, kseq, kx2 = jax.random.split(key, 5)

    # Parameter shapes match torch.rand(...): _mu/_sigma (1, n_rules, n_inputs), _seq (n_rules, n_outputs).
    mu = jax.random.uniform(kmu, (1, N_RULES, N_INPUTS), dtype=jnp.float32)[0]
    sigma = jax.random.uniform(ksig, (1, N_RULES, N_INPUTS), dtype=jnp.float32)[0]
    seq = jax.random.uniform(kseq, (N_RULES, N_OUTPUTS), dtype=jnp.float32)

    # Small batch: single tile, block == full dims.
    x = jax.random.uniform(kx, (B, N_INPUTS), dtype=jnp.float32)
    out = jax.block_until_ready(anfis_forward(x, mu, sigma, seq))
    ref = anfis_reference(x, mu, sigma, seq)
    assert out.shape == (B, N_OUTPUTS)
    assert jnp.allclose(out, ref, atol=1e-5, rtol=1e-5), float(jnp.max(jnp.abs(out - ref)))

    # Larger batch: multi-tile grid + in-kernel chunk loop + ragged tail + padding path.
    B2 = 5000
    x2 = jax.random.uniform(kx2, (B2, N_INPUTS), dtype=jnp.float32)
    out2 = jax.block_until_ready(anfis_forward(x2, mu, sigma, seq, batch_tile=4096))
    ref2 = anfis_reference(x2, mu, sigma, seq)
    assert out2.shape == (B2, N_OUTPUTS)
    assert jnp.allclose(out2, ref2, atol=1e-5, rtol=1e-5), float(jnp.max(jnp.abs(out2 - ref2)))

    print("KERNEL_OK")
</pallas_src>

<mosaic_0001>
module attributes {stable_mosaic.version = 11 : i64} {
  func.func @anfis_kernel(%arg0: i32, %arg1: memref<4x1x128xf32, #tpu.memory_space<vmem>>, %arg2: memref<16x4xf32, #tpu.memory_space<smem>>, %arg3: memref<16x4xf32, #tpu.memory_space<smem>>, %arg4: memref<16x4xf32, #tpu.memory_space<smem>>, %arg5: memref<4x1x128xf32, #tpu.memory_space<vmem>>) attributes {dimension_semantics = [#tpu.dimension_semantics<parallel>], iteration_bounds = array<i64: 1>, scalar_prefetch = 0 : i64, scratch_operands = 0 : i64, tpu.core_type = #tpu.core_type<tc>, window_params = [{transform_indices = @transform_0, window_bounds = array<i64: 4, 1, 128>}, {transform_indices = @transform_1, window_bounds = array<i64: 16, 4>}, {transform_indices = @transform_2, window_bounds = array<i64: 16, 4>}, {transform_indices = @transform_3, window_bounds = array<i64: 16, 4>}, {transform_indices = @transform_4, window_bounds = array<i64: 4, 1, 128>}]} {
    %c0 = arith.constant 0 : index
    %c0_0 = arith.constant 0 : index
    %c0_1 = arith.constant 0 : index
    %0 = vector.load %arg1[%c0, %c0_0, %c0_1] : memref<4x1x128xf32, #tpu.memory_space<vmem>>, vector<1x1x128xf32>
    %1 = vector.shape_cast %0 : vector<1x1x128xf32> to vector<1x128xf32>
    %c1 = arith.constant 1 : index
    %c0_2 = arith.constant 0 : index
    %c0_3 = arith.constant 0 : index
    %2 = vector.load %arg1[%c1, %c0_2, %c0_3] : memref<4x1x128xf32, #tpu.memory_space<vmem>>, vector<1x1x128xf32>
    %3 = vector.shape_cast %2 : vector<1x1x128xf32> to vector<1x128xf32>
    %c2 = arith.constant 2 : index
    %c0_4 = arith.constant 0 : index
    %c0_5 = arith.constant 0 : index
    %4 = vector.load %arg1[%c2, %c0_4, %c0_5] : memref<4x1x128xf32, #tpu.memory_space<vmem>>, vector<1x1x128xf32>
    %5 = vector.shape_cast %4 : vector<1x1x128xf32> to vector<1x128xf32>
    %c3 = arith.constant 3 : index
    %c0_6 = arith.constant 0 : index
    %c0_7 = arith.constant 0 : index
    %6 = vector.load %arg1[%c3, %c0_6, %c0_7] : memref<4x1x128xf32, #tpu.memory_space<vmem>>, vector<1x1x128xf32>
    %7 = vector.shape_cast %6 : vector<1x1x128xf32> to vector<1x128xf32>
    %c0_8 = arith.constant 0 : index
    %c0_9 = arith.constant 0 : index
    %8 = memref.load %arg2[%c0_8, %c0_9] : memref<16x4xf32, #tpu.memory_space<smem>>
    %9 = vector.broadcast %8 : f32 to vector<1x128xf32>
    %10 = arith.subf %1, %9 : vector<1x128xf32>
    %11 = arith.mulf %10, %10 : vector<1x128xf32>
    %c0_10 = arith.constant 0 : index
    %c0_11 = arith.constant 0 : index
    %12 = memref.load %arg3[%c0_10, %c0_11] : memref<16x4xf32, #tpu.memory_space<smem>>
    %13 = vector.broadcast %12 : f32 to vector<1x128xf32>
    %14 = arith.mulf %11, %13 : vector<1x128xf32>
    %c0_12 = arith.constant 0 : index
    %c1_13 = arith.constant 1 : index
    %15 = memref.load %arg2[%c0_12, %c1_13] : memref<16x4xf32, #tpu.memory_space<smem>>
    %16 = vector.broadcast %15 : f32 to vector<1x128xf32>
    %17 = arith.subf %3, %16 : vector<1x128xf32>
    %18 = arith.mulf %17, %17 : vector<1x128xf32>
    %c0_14 = arith.constant 0 : index
    %c1_15 = arith.constant 1 : index
    %19 = memref.load %arg3[%c0_14, %c1_15] : memref<16x4xf32, #tpu.memory_space<smem>>
    %20 = vector.broadcast %19 : f32 to vector<1x128xf32>
    %21 = arith.mulf %18, %20 : vector<1x128xf32>
    %22 = arith.minimumf %14, %21 : vector<1x128xf32>
    %c0_16 = arith.constant 0 : index
    %c2_17 = arith.constant 2 : index
    %23 = memref.load %arg2[%c0_16, %c2_17] : memref<16x4xf32, #tpu.memory_space<smem>>
    %24 = vector.broadcast %23 : f32 to vector<1x128xf32>
    %25 = arith.subf %5, %24 : vector<1x128xf32>
    %26 = arith.mulf %25, %25 : vector<1x128xf32>
    %c0_18 = arith.constant 0 : index
    %c2_19 = arith.constant 2 : index
    %27 = memref.load %arg3[%c0_18, %c2_19] : memref<16x4xf32, #tpu.memory_space<smem>>
    %28 = vector.broadcast %27 : f32 to vector<1x128xf32>
    %29 = arith.mulf %26, %28 : vector<1x128xf32>
    %30 = arith.minimumf %22, %29 : vector<1x128xf32>
    %c0_20 = arith.constant 0 : index
    %c3_21 = arith.constant 3 : index
    %31 = memref.load %arg2[%c0_20, %c3_21] : memref<16x4xf32, #tpu.memory_space<smem>>
    %32 = vector.broadcast %31 : f32 to vector<1x128xf32>
    %33 = arith.subf %7, %32 : vector<1x128xf32>
    %34 = arith.mulf %33, %33 : vector<1x128xf32>
    %c0_22 = arith.constant 0 : index
    %c3_23 = arith.constant 3 : index
    %35 = memref.load %arg3[%c0_22, %c3_23] : memref<16x4xf32, #tpu.memory_space<smem>>
    %36 = vector.broadcast %35 : f32 to vector<1x128xf32>
    %37 = arith.mulf %34, %36 : vector<1x128xf32>
    %38 = arith.minimumf %30, %37 : vector<1x128xf32>
    %39 = math.exp %38 : vector<1x128xf32>
    %c0_24 = arith.constant 0 : index
    %c0_25 = arith.constant 0 : index
    %40 = memref.load %arg4[%c0_24, %c0_25] : memref<16x4xf32, #tpu.memory_space<smem>>
    %41 = vector.broadcast %40 : f32 to vector<1x128xf32>
    %42 = arith.mulf %39, %41 : vector<1x128xf32>
    %c0_26 = arith.constant 0 : index
    %c1_27 = arith.constant 1 : index
    %43 = memref.load %arg4[%c0_26, %c1_27] : memref<16x4xf32, #tpu.memory_space<smem>>
    %44 = vector.broadcast %43 : f32 to vector<1x128xf32>
    %45 = arith.mulf %39, %44 : vector<1x128xf32>
    %c0_28 = arith.constant 0 : index
    %c2_29 = arith.constant 2 : index
    %46 = memref.load %arg4[%c0_28, %c2_29] : memref<16x4xf32, #tpu.memory_space<smem>>
    %47 = vector.broadcast %46 : f32 to vector<1x128xf32>
    %48 = arith.mulf %39, %47 : vector<1x128xf32>
    %c0_30 = arith.constant 0 : index
    %c3_31 = arith.constant 3 : index
    %49 = memref.load %arg4[%c0_30, %c3_31] : memref<16x4xf32, #tpu.memory_space<smem>>
    %50 = vector.broadcast %49 : f32 to vector<1x128xf32>
    %51 = arith.mulf %39, %50 : vector<1x128xf32>
    %c1_32 = arith.constant 1 : index
    %c0_33 = arith.constant 0 : index
    %52 = memref.load %arg2[%c1_32, %c0_33] : memref<16x4xf32, #tpu.memory_space<smem>>
    %53 = vector.broadcast %52 : f32 to vector<1x128xf32>
    %54 = arith.subf %1, %53 : vector<1x128xf32>
    %55 = arith.mulf %54, %54 : vector<1x128xf32>
    %c1_34 = arith.constant 1 : index
    %c0_35 = arith.constant 0 : index
    %56 = memref.load %arg3[%c1_34, %c0_35] : memref<16x4xf32, #tpu.memory_space<smem>>
    %57 = vector.broadcast %56 : f32 to vector<1x128xf32>
    %58 = arith.mulf %55, %57 : vector<1x128xf32>
    %c1_36 = arith.constant 1 : index
    %c1_37 = arith.constant 1 : index
    %59 = memref.load %arg2[%c1_36, %c1_37] : memref<16x4xf32, #tpu.memory_space<smem>>
    %60 = vector.broadcast %59 : f32 to vector<1x128xf32>
    %61 = arith.subf %3, %60 : vector<1x128xf32>
    %62 = arith.mulf %61, %61 : vector<1x128xf32>
    %c1_38 = arith.constant 1 : index
    %c1_39 = arith.constant 1 : index
    %63 = memref.load %arg3[%c1_38, %c1_39] : memref<16x4xf32, #tpu.memory_space<smem>>
    %64 = vector.broadcast %63 : f32 to vector<1x128xf32>
    %65 = arith.mulf %62, %64 : vector<1x128xf32>
    %66 = arith.minimumf %58, %65 : vector<1x128xf32>
    %c1_40 = arith.constant 1 : index
    %c2_41 = arith.constant 2 : index
    %67 = memref.load %arg2[%c1_40, %c2_41] : memref<16x4xf32, #tpu.memory_space<smem>>
    %68 = vector.broadcast %67 : f32 to vector<1x128xf32>
    %69 = arith.subf %5, %68 : vector<1x128xf32>
    %70 = arith.mulf %69, %69 : vector<1x128xf32>
    %c1_42 = arith.constant 1 : index
    %c2_43 = arith.constant 2 : index
    %71 = memref.load %arg3[%c1_42, %c2_43] : memref<16x4xf32, #tpu.memory_space<smem>>
    %72 = vector.broadcast %71 : f32 to vector<1x128xf32>
    %73 = arith.mulf %70, %72 : vector<1x128xf32>
    %74 = arith.minimumf %66, %73 : vector<1x128xf32>
    %c1_44 = arith.constant 1 : index
    %c3_45 = arith.constant 3 : index
    %75 = memref.load %arg2[%c1_44, %c3_45] : memref<16x4xf32, #tpu.memory_space<smem>>
    %76 = vector.broadcast %75 : f32 to vector<1x128xf32>
    %77 = arith.subf %7, %76 : vector<1x128xf32>
    %78 = arith.mulf %77, %77 : vector<1x128xf32>
    %c1_46 = arith.constant 1 : index
    %c3_47 = arith.constant 3 : index
    %79 = memref.load %arg3[%c1_46, %c3_47] : memref<16x4xf32, #tpu.memory_space<smem>>
    %80 = vector.broadcast %79 : f32 to vector<1x128xf32>
    %81 = arith.mulf %78, %80 : vector<1x128xf32>
    %82 = arith.minimumf %74, %81 : vector<1x128xf32>
    %83 = math.exp %82 : vector<1x128xf32>
    %84 = arith.addf %39, %83 : vector<1x128xf32>
    %c1_48 = arith.constant 1 : index
    %c0_49 = arith.constant 0 : index
    %85 = memref.load %arg4[%c1_48, %c0_49] : memref<16x4xf32, #tpu.memory_space<smem>>
    %86 = vector.broadcast %85 : f32 to vector<1x128xf32>
    %87 = arith.mulf %83, %86 : vector<1x128xf32>
    %88 = arith.addf %42, %87 : vector<1x128xf32>
    %c1_50 = arith.constant 1 : index
    %c1_51 = arith.constant 1 : index
    %89 = memref.load %arg4[%c1_50, %c1_51] : memref<16x4xf32, #tpu.memory_space<smem>>
    %90 = vector.broadcast %89 : f32 to vector<1x128xf32>
    %91 = arith.mulf %83, %90 : vector<1x128xf32>
    %92 = arith.addf %45, %91 : vector<1x128xf32>
    %c1_52 = arith.constant 1 : index
    %c2_53 = arith.constant 2 : index
    %93 = memref.load %arg4[%c1_52, %c2_53] : memref<16x4xf32, #tpu.memory_space<smem>>
    %94 = vector.broadcast %93 : f32 to vector<1x128xf32>
    %95 = arith.mulf %83, %94 : vector<1x128xf32>
    %96 = arith.addf %48, %95 : vector<1x128xf32>
    %c1_54 = arith.constant 1 : index
    %c3_55 = arith.constant 3 : index
    %97 = memref.load %arg4[%c1_54, %c3_55] : memref<16x4xf32, #tpu.memory_space<smem>>
    %98 = vector.broadcast %97 : f32 to vector<1x128xf32>
    %99 = arith.mulf %83, %98 : vector<1x128xf32>
    %100 = arith.addf %51, %99 : vector<1x128xf32>
    %c2_56 = arith.constant 2 : index
    %c0_57 = arith.constant 0 : index
    %101 = memref.load %arg2[%c2_56, %c0_57] : memref<16x4xf32, #tpu.memory_space<smem>>
    %102 = vector.broadcast %101 : f32 to vector<1x128xf32>
    %103 = arith.subf %1, %102 : vector<1x128xf32>
    %104 = arith.mulf %103, %103 : vector<1x128xf32>
    %c2_58 = arith.constant 2 : index
    %c0_59 = arith.constant 0 : index
    %105 = memref.load %arg3[%c2_58, %c0_59] : memref<16x4xf32, #tpu.memory_space<smem>>
    %106 = vector.broadcast %105 : f32 to vector<1x128xf32>
    %107 = arith.mulf %104, %106 : vector<1x128xf32>
    %c2_60 = arith.constant 2 : index
    %c1_61 = arith.constant 1 : index
    %108 = memref.load %arg2[%c2_60, %c1_61] : memref<16x4xf32, #tpu.memory_space<smem>>
    %109 = vector.broadcast %108 : f32 to vector<1x128xf32>
    %110 = arith.subf %3, %109 : vector<1x128xf32>
    %111 = arith.mulf %110, %110 : vector<1x128xf32>
    %c2_62 = arith.constant 2 : index
    %c1_63 = arith.constant 1 : index
    %112 = memref.load %arg3[%c2_62, %c1_63] : memref<16x4xf32, #tpu.memory_space<smem>>
    %113 = vector.broadcast %112 : f32 to vector<1x128xf32>
    %114 = arith.mulf %111, %113 : vector<1x128xf32>
    %115 = arith.minimumf %107, %114 : vector<1x128xf32>
    %c2_64 = arith.constant 2 : index
    %c2_65 = arith.constant 2 : index
    %116 = memref.load %arg2[%c2_64, %c2_65] : memref<16x4xf32, #tpu.memory_space<smem>>
    %117 = vector.broadcast %116 : f32 to vector<1x128xf32>
    %118 = arith.subf %5, %117 : vector<1x128xf32>
    %119 = arith.mulf %118, %118 : vector<1x128xf32>
    %c2_66 = arith.constant 2 : index
    %c2_67 = arith.constant 2 : index
    %120 = memref.load %arg3[%c2_66, %c2_67] : memref<16x4xf32, #tpu.memory_space<smem>>
    %121 = vector.broadcast %120 : f32 to vector<1x128xf32>
    %122 = arith.mulf %119, %121 : vector<1x128xf32>
    %123 = arith.minimumf %115, %122 : vector<1x128xf32>
    %c2_68 = arith.constant 2 : index
    %c3_69 = arith.constant 3 : index
    %124 = memref.load %arg2[%c2_68, %c3_69] : memref<16x4xf32, #tpu.memory_space<smem>>
    %125 = vector.broadcast %124 : f32 to vector<1x128xf32>
    %126 = arith.subf %7, %125 : vector<1x128xf32>
    %127 = arith.mulf %126, %126 : vector<1x128xf32>
    %c2_70 = arith.constant 2 : index
    %c3_71 = arith.constant 3 : index
    %128 = memref.load %arg3[%c2_70, %c3_71] : memref<16x4xf32, #tpu.memory_space<smem>>
    %129 = vector.broadcast %128 : f32 to vector<1x128xf32>
    %130 = arith.mulf %127, %129 : vector<1x128xf32>
    %131 = arith.minimumf %123, %130 : vector<1x128xf32>
    %132 = math.exp %131 : vector<1x128xf32>
    %133 = arith.addf %84, %132 : vector<1x128xf32>
    %c2_72 = arith.constant 2 : index
    %c0_73 = arith.constant 0 : index
    %134 = memref.load %arg4[%c2_72, %c0_73] : memref<16x4xf32, #tpu.memory_space<smem>>
    %135 = vector.broadcast %134 : f32 to vector<1x128xf32>
    %136 = arith.mulf %132, %135 : vector<1x128xf32>
    %137 = arith.addf %88, %136 : vector<1x128xf32>
    %c2_74 = arith.constant 2 : index
    %c1_75 = arith.constant 1 : index
    %138 = memref.load %arg4[%c2_74, %c1_75] : memref<16x4xf32, #tpu.memory_space<smem>>
    %139 = vector.broadcast %138 : f32 to vector<1x128xf32>
    %140 = arith.mulf %132, %139 : vector<1x128xf32>
    %141 = arith.addf %92, %140 : vector<1x128xf32>
    %c2_76 = arith.constant 2 : index
    %c2_77 = arith.constant 2 : index
    %142 = memref.load %arg4[%c2_76, %c2_77] : memref<16x4xf32, #tpu.memory_space<smem>>
    %143 = vector.broadcast %142 : f32 to vector<1x128xf32>
    %144 = arith.mulf %132, %143 : vector<1x128xf32>
    %145 = arith.addf %96, %144 : vector<1x128xf32>
    %c2_78 = arith.constant 2 : index
    %c3_79 = arith.constant 3 : index
    %146 = memref.load %arg4[%c2_78, %c3_79] : memref<16x4xf32, #tpu.memory_space<smem>>
    %147 = vector.broadcast %146 : f32 to vector<1x128xf32>
    %148 = arith.mulf %132, %147 : vector<1x128xf32>
    %149 = arith.addf %100, %148 : vector<1x128xf32>
    %c3_80 = arith.constant 3 : index
    %c0_81 = arith.constant 0 : index
    %150 = memref.load %arg2[%c3_80, %c0_81] : memref<16x4xf32, #tpu.memory_space<smem>>
    %151 = vector.broadcast %150 : f32 to vector<1x128xf32>
    %152 = arith.subf %1, %151 : vector<1x128xf32>
    %153 = arith.mulf %152, %152 : vector<1x128xf32>
    %c3_82 = arith.constant 3 : index
    %c0_83 = arith.constant 0 : index
    %154 = memref.load %arg3[%c3_82, %c0_83] : memref<16x4xf32, #tpu.memory_space<smem>>
    %155 = vector.broadcast %154 : f32 to vector<1x128xf32>
    %156 = arith.mulf %153, %155 : vector<1x128xf32>
    %c3_84 = arith.constant 3 : index
    %c1_85 = arith.constant 1 : index
    %157 = memref.load %arg2[%c3_84, %c1_85] : memref<16x4xf32, #tpu.memory_space<smem>>
    %158 = vector.broadcast %157 : f32 to vector<1x128xf32>
    %159 = arith.subf %3, %158 : vector<1x128xf32>
    %160 = arith.mulf %159, %159 : vector<1x128xf32>
    %c3_86 = arith.constant 3 : index
    %c1_87 = arith.constant 1 : index
    %161 = memref.load %arg3[%c3_86, %c1_87] : memref<16x4xf32, #tpu.memory_space<smem>>
    %162 = vector.broadcast %161 : f32 to vector<1x128xf32>
    %163 = arith.mulf %160, %162 : vector<1x128xf32>
    %164 = arith.minimumf %156, %163 : vector<1x128xf32>
    %c3_88 = arith.constant 3 : index
    %c2_89 = arith.constant 2 : index
    %165 = memref.load %arg2[%c3_88, %c2_89] : memref<16x4xf32, #tpu.memory_space<smem>>
    %166 = vector.broadcast %165 : f32 to vector<1x128xf32>
    %167 = arith.subf %5, %166 : vector<1x128xf32>
    %168 = arith.mulf %167, %167 : vector<1x128xf32>
    %c3_90 = arith.constant 3 : index
    %c2_91 = arith.constant 2 : index
    %169 = memref.load %arg3[%c3_90, %c2_91] : memref<16x4xf32, #tpu.memory_space<smem>>
    %170 = vector.broadcast %169 : f32 to vector<1x128xf32>
    %171 = arith.mulf %168, %170 : vector<1x128xf32>
    %172 = arith.minimumf %164, %171 : vector<1x128xf32>
    %c3_92 = arith.constant 3 : index
    %c3_93 = arith.constant 3 : index
    %173 = memref.load %arg2[%c3_92, %c3_93] : memref<16x4xf32, #tpu.memory_space<smem>>
    %174 = vector.broadcast %173 : f32 to vector<1x128xf32>
    %175 = arith.subf %7, %174 : vector<1x128xf32>
    %176 = arith.mulf %175, %175 : vector<1x128xf32>
    %c3_94 = arith.constant 3 : index
    %c3_95 = arith.constant 3 : index
    %177 = memref.load %arg3[%c3_94, %c3_95] : memref<16x4xf32, #tpu.memory_space<smem>>
    %178 = vector.broadcast %177 : f32 to vector<1x128xf32>
    %179 = arith.mulf %176, %178 : vector<1x128xf32>
    %180 = arith.minimumf %172, %179 : vector<1x128xf32>
    %181 = math.exp %180 : vector<1x128xf32>
    %182 = arith.addf %133, %181 : vector<1x128xf32>
    %c3_96 = arith.constant 3 : index
    %c0_97 = arith.constant 0 : index
    %183 = memref.load %arg4[%c3_96, %c0_97] : memref<16x4xf32, #tpu.memory_space<smem>>
    %184 = vector.broadcast %183 : f32 to vector<1x128xf32>
    %185 = arith.mulf %181, %184 : vector<1x128xf32>
    %186 = arith.addf %137, %185 : vector<1x128xf32>
    %c3_98 = arith.constant 3 : index
    %c1_99 = arith.constant 1 : index
    %187 = memref.load %arg4[%c3_98, %c1_99] : memref<16x4xf32, #tpu.memory_space<smem>>
    %188 = vector.broadcast %187 : f32 to vector<1x128xf32>
    %189 = arith.mulf %181, %188 : vector<1x128xf32>
    %190 = arith.addf %141, %189 : vector<1x128xf32>
    %c3_100 = arith.constant 3 : index
    %c2_101 = arith.constant 2 : index
    %191 = memref.load %arg4[%c3_100, %c2_101] : memref<16x4xf32, #tpu.memory_space<smem>>
    %192 = vector.broadcast %191 : f32 to vector<1x128xf32>
    %193 = arith.mulf %181, %192 : vector<1x128xf32>
    %194 = arith.addf %145, %193 : vector<1x128xf32>
    %c3_102 = arith.constant 3 : index
    %c3_103 = arith.constant 3 : index
    %195 = memref.load %arg4[%c3_102, %c3_103] : memref<16x4xf32, #tpu.memory_space<smem>>
    %196 = vector.broadcast %195 : f32 to vector<1x128xf32>
    %197 = arith.mulf %181, %196 : vector<1x128xf32>
    %198 = arith.addf %149, %197 : vector<1x128xf32>
    %c4 = arith.constant 4 : index
    %c0_104 = arith.constant 0 : index
    %199 = memref.load %arg2[%c4, %c0_104] : memref<16x4xf32, #tpu.memory_space<smem>>
    %200 = vector.broadcast %199 : f32 to vector<1x128xf32>
    %201 = arith.subf %1, %200 : vector<1x128xf32>
    %202 = arith.mulf %201, %201 : vector<1x128xf32>
    %c4_105 = arith.constant 4 : index
    %c0_106 = arith.constant 0 : index
    %203 = memref.load %arg3[%c4_105, %c0_106] : memref<16x4xf32, #tpu.memory_space<smem>>
    %204 = vector.broadcast %203 : f32 to vector<1x128xf32>
    %205 = arith.mulf %202, %204 : vector<1x128xf32>
    %c4_107 = arith.constant 4 : index
    %c1_108 = arith.constant 1 : index
    %206 = memref.load %arg2[%c4_107, %c1_108] : memref<16x4xf32, #tpu.memory_space<smem>>
    %207 = vector.broadcast %206 : f32 to vector<1x128xf32>
    %208 = arith.subf %3, %207 : vector<1x128xf32>
    %209 = arith.mulf %208, %208 : vector<1x128xf32>
    %c4_109 = arith.constant 4 : index
    %c1_110 = arith.constant 1 : index
    %210 = memref.load %arg3[%c4_109, %c1_110] : memref<16x4xf32, #tpu.memory_space<smem>>
    %211 = vector.broadcast %210 : f32 to vector<1x128xf32>
    %212 = arith.mulf %209, %211 : vector<1x128xf32>
    %213 = arith.minimumf %205, %212 : vector<1x128xf32>
    %c4_111 = arith.constant 4 : index
    %c2_112 = arith.constant 2 : index
    %214 = memref.load %arg2[%c4_111, %c2_112] : memref<16x4xf32, #tpu.memory_space<smem>>
    %215 = vector.broadcast %214 : f32 to vector<1x128xf32>
    %216 = arith.subf %5, %215 : vector<1x128xf32>
    %217 = arith.mulf %216, %216 : vector<1x128xf32>
    %c4_113 = arith.constant 4 : index
    %c2_114 = arith.constant 2 : index
    %218 = memref.load %arg3[%c4_113, %c2_114] : memref<16x4xf32, #tpu.memory_space<smem>>
    %219 = vector.broadcast %218 : f32 to vector<1x128xf32>
    %220 = arith.mulf %217, %219 : vector<1x128xf32>
    %221 = arith.minimumf %213, %220 : vector<1x128xf32>
    %c4_115 = arith.constant 4 : index
    %c3_116 = arith.constant 3 : index
    %222 = memref.load %arg2[%c4_115, %c3_116] : memref<16x4xf32, #tpu.memory_space<smem>>
    %223 = vector.broadcast %222 : f32 to vector<1x128xf32>
    %224 = arith.subf %7, %223 : vector<1x128xf32>
    %225 = arith.mulf %224, %224 : vector<1x128xf32>
    %c4_117 = arith.constant 4 : index
    %c3_118 = arith.constant 3 : index
    %226 = memref.load %arg3[%c4_117, %c3_118] : memref<16x4xf32, #tpu.memory_space<smem>>
    %227 = vector.broadcast %226 : f32 to vector<1x128xf32>
    %228 = arith.mulf %225, %227 : vector<1x128xf32>
    %229 = arith.minimumf %221, %228 : vector<1x128xf32>
    %230 = math.exp %229 : vector<1x128xf32>
    %231 = arith.addf %182, %230 : vector<1x128xf32>
    %c4_119 = arith.constant 4 : index
    %c0_120 = arith.constant 0 : index
    %232 = memref.load %arg4[%c4_119, %c0_120] : memref<16x4xf32, #tpu.memory_space<smem>>
    %233 = vector.broadcast %232 : f32 to vector<1x128xf32>
    %234 = arith.mulf %230, %233 : vector<1x128xf32>
    %235 = arith.addf %186, %234 : vector<1x128xf32>
    %c4_121 = arith.constant 4 : index
    %c1_122 = arith.constant 1 : index
    %236 = memref.load %arg4[%c4_121, %c1_122] : memref<16x4xf32, #tpu.memory_space<smem>>
    %237 = vector.broadcast %236 : f32 to vector<1x128xf32>
    %238 = arith.mulf %230, %237 : vector<1x128xf32>
    %239 = arith.addf %190, %238 : vector<1x128xf32>
    %c4_123 = arith.constant 4 : index
    %c2_124 = arith.constant 2 : index
    %240 = memref.load %arg4[%c4_123, %c2_124] : memref<16x4xf32, #tpu.memory_space<smem>>
    %241 = vector.broadcast %240 : f32 to vector<1x128xf32>
    %242 = arith.mulf %230, %241 : vector<1x128xf32>
    %243 = arith.addf %194, %242 : vector<1x128xf32>
    %c4_125 = arith.constant 4 : index
    %c3_126 = arith.constant 3 : index
    %244 = memref.load %arg4[%c4_125, %c3_126] : memref<16x4xf32, #tpu.memory_space<smem>>
    %245 = vector.broadcast %244 : f32 to vector<1x128xf32>
    %246 = arith.mulf %230, %245 : vector<1x128xf32>
    %247 = arith.addf %198, %246 : vector<1x128xf32>
    %c5 = arith.constant 5 : index
    %c0_127 = arith.constant 0 : index
    %248 = memref.load %arg2[%c5, %c0_127] : memref<16x4xf32, #tpu.memory_space<smem>>
    %249 = vector.broadcast %248 : f32 to vector<1x128xf32>
    %250 = arith.subf %1, %249 : vector<1x128xf32>
    %251 = arith.mulf %250, %250 : vector<1x128xf32>
    %c5_128 = arith.constant 5 : index
    %c0_129 = arith.constant 0 : index
    %252 = memref.load %arg3[%c5_128, %c0_129] : memref<16x4xf32, #tpu.memory_space<smem>>
    %253 = vector.broadcast %252 : f32 to vector<1x128xf32>
    %254 = arith.mulf %251, %253 : vector<1x128xf32>
    %c5_130 = arith.constant 5 : index
    %c1_131 = arith.constant 1 : index
    %255 = memref.load %arg2[%c5_130, %c1_131] : memref<16x4xf32, #tpu.memory_space<smem>>
    %256 = vector.broadcast %255 : f32 to vector<1x128xf32>
    %257 = arith.subf %3, %256 : vector<1x128xf32>
    %258 = arith.mulf %257, %257 : vector<1x128xf32>
    %c5_132 = arith.constant 5 : index
    %c1_133 = arith.constant 1 : index
    %259 = memref.load %arg3[%c5_132, %c1_133] : memref<16x4xf32, #tpu.memory_space<smem>>
    %260 = vector.broadcast %259 : f32 to vector<1x128xf32>
    %261 = arith.mulf %258, %260 : vector<1x128xf32>
    %262 = arith.minimumf %254, %261 : vector<1x128xf32>
    %c5_134 = arith.constant 5 : index
    %c2_135 = arith.constant 2 : index
    %263 = memref.load %arg2[%c5_134, %c2_135] : memref<16x4xf32, #tpu.memory_space<smem>>
    %264 = vector.broadcast %263 : f32 to vector<1x128xf32>
    %265 = arith.subf %5, %264 : vector<1x128xf32>
    %266 = arith.mulf %265, %265 : vector<1x128xf32>
    %c5_136 = arith.constant 5 : index
    %c2_137 = arith.constant 2 : index
    %267 = memref.load %arg3[%c5_136, %c2_137] : memref<16x4xf32, #tpu.memory_space<smem>>
    %268 = vector.broadcast %267 : f32 to vector<1x128xf32>
    %269 = arith.mulf %266, %268 : vector<1x128xf32>
    %270 = arith.minimumf %262, %269 : vector<1x128xf32>
    %c5_138 = arith.constant 5 : index
    %c3_139 = arith.constant 3 : index
    %271 = memref.load %arg2[%c5_138, %c3_139] : memref<16x4xf32, #tpu.memory_space<smem>>
    %272 = vector.broadcast %271 : f32 to vector<1x128xf32>
    %273 = arith.subf %7, %272 : vector<1x128xf32>
    %274 = arith.mulf %273, %273 : vector<1x128xf32>
    %c5_140 = arith.constant 5 : index
    %c3_141 = arith.constant 3 : index
    %275 = memref.load %arg3[%c5_140, %c3_141] : memref<16x4xf32, #tpu.memory_space<smem>>
    %276 = vector.broadcast %275 : f32 to vector<1x128xf32>
    %277 = arith.mulf %274, %276 : vector<1x128xf32>
    %278 = arith.minimumf %270, %277 : vector<1x128xf32>
    %279 = math.exp %278 : vector<1x128xf32>
    %280 = arith.addf %231, %279 : vector<1x128xf32>
    %c5_142 = arith.constant 5 : index
    %c0_143 = arith.constant 0 : index
    %281 = memref.load %arg4[%c5_142, %c0_143] : memref<16x4xf32, #tpu.memory_space<smem>>
    %282 = vector.broadcast %281 : f32 to vector<1x128xf32>
    %283 = arith.mulf %279, %282 : vector<1x128xf32>
    %284 = arith.addf %235, %283 : vector<1x128xf32>
    %c5_144 = arith.constant 5 : index
    %c1_145 = arith.constant 1 : index
    %285 = memref.load %arg4[%c5_144, %c1_145] : memref<16x4xf32, #tpu.memory_space<smem>>
    %286 = vector.broadcast %285 : f32 to vector<1x128xf32>
    %287 = arith.mulf %279, %286 : vector<1x128xf32>
    %288 = arith.addf %239, %287 : vector<1x128xf32>
    %c5_146 = arith.constant 5 : index
    %c2_147 = arith.constant 2 : index
    %289 = memref.load %arg4[%c5_146, %c2_147] : memref<16x4xf32, #tpu.memory_space<smem>>
    %290 = vector.broadcast %289 : f32 to vector<1x128xf32>
    %291 = arith.mulf %279, %290 : vector<1x128xf32>
    %292 = arith.addf %243, %291 : vector<1x128xf32>
    %c5_148 = arith.constant 5 : index
    %c3_149 = arith.constant 3 : index
    %293 = memref.load %arg4[%c5_148, %c3_149] : memref<16x4xf32, #tpu.memory_space<smem>>
    %294 = vector.broadcast %293 : f32 to vector<1x128xf32>
    %295 = arith.mulf %279, %294 : vector<1x128xf32>
    %296 = arith.addf %247, %295 : vector<1x128xf32>
    %c6 = arith.constant 6 : index
    %c0_150 = arith.constant 0 : index
    %297 = memref.load %arg2[%c6, %c0_150] : memref<16x4xf32, #tpu.memory_space<smem>>
    %298 = vector.broadcast %297 : f32 to vector<1x128xf32>
    %299 = arith.subf %1, %298 : vector<1x128xf32>
    %300 = arith.mulf %299, %299 : vector<1x128xf32>
    %c6_151 = arith.constant 6 : index
    %c0_152 = arith.constant 0 : index
    %301 = memref.load %arg3[%c6_151, %c0_152] : memref<16x4xf32, #tpu.memory_space<smem>>
    %302 = vector.broadcast %301 : f32 to vector<1x128xf32>
    %303 = arith.mulf %300, %302 : vector<1x128xf32>
    %c6_153 = arith.constant 6 : index
    %c1_154 = arith.constant 1 : index
    %304 = memref.load %arg2[%c6_153, %c1_154] : memref<16x4xf32, #tpu.memory_space<smem>>
    %305 = vector.broadcast %304 : f32 to vector<1x128xf32>
    %306 = arith.subf %3, %305 : vector<1x128xf32>
    %307 = arith.mulf %306, %306 : vector<1x128xf32>
    %c6_155 = arith.constant 6 : index
    %c1_156 = arith.constant 1 : index
    %308 = memref.load %arg3[%c6_155, %c1_156] : memref<16x4xf32, #tpu.memory_space<smem>>
    %309 = vector.broadcast %308 : f32 to vector<1x128xf32>
    %310 = arith.mulf %307, %309 : vector<1x128xf32>
    %311 = arith.minimumf %303, %310 : vector<1x128xf32>
    %c6_157 = arith.constant 6 : index
    %c2_158 = arith.constant 2 : index
    %312 = memref.load %arg2[%c6_157, %c2_158] : memref<16x4xf32, #tpu.memory_space<smem>>
    %313 = vector.broadcast %312 : f32 to vector<1x128xf32>
    %314 = arith.subf %5, %313 : vector<1x128xf32>
    %315 = arith.mulf %314, %314 : vector<1x128xf32>
    %c6_159 = arith.constant 6 : index
    %c2_160 = arith.constant 2 : index
    %316 = memref.load %arg3[%c6_159, %c2_160] : memref<16x4xf32, #tpu.memory_space<smem>>
    %317 = vector.broadcast %316 : f32 to vector<1x128xf32>
    %318 = arith.mulf %315, %317 : vector<1x128xf32>
    %319 = arith.minimumf %311, %318 : vector<1x128xf32>
    %c6_161 = arith.constant 6 : index
    %c3_162 = arith.constant 3 : index
    %320 = memref.load %arg2[%c6_161, %c3_162] : memref<16x4xf32, #tpu.memory_space<smem>>
    %321 = vector.broadcast %320 : f32 to vector<1x128xf32>
    %322 = arith.subf %7, %321 : vector<1x128xf32>
    %323 = arith.mulf %322, %322 : vector<1x128xf32>
    %c6_163 = arith.constant 6 : index
    %c3_164 = arith.constant 3 : index
    %324 = memref.load %arg3[%c6_163, %c3_164] : memref<16x4xf32, #tpu.memory_space<smem>>
    %325 = vector.broadcast %324 : f32 to vector<1x128xf32>
    %326 = arith.mulf %323, %325 : vector<1x128xf32>
    %327 = arith.minimumf %319, %326 : vector<1x128xf32>
    %328 = math.exp %327 : vector<1x128xf32>
    %329 = arith.addf %280, %328 : vector<1x128xf32>
    %c6_165 = arith.constant 6 : index
    %c0_166 = arith.constant 0 : index
    %330 = memref.load %arg4[%c6_165, %c0_166] : memref<16x4xf32, #tpu.memory_space<smem>>
    %331 = vector.broadcast %330 : f32 to vector<1x128xf32>
    %332 = arith.mulf %328, %331 : vector<1x128xf32>
    %333 = arith.addf %284, %332 : vector<1x128xf32>
    %c6_167 = arith.constant 6 : index
    %c1_168 = arith.constant 1 : index
    %334 = memref.load %arg4[%c6_167, %c1_168] : memref<16x4xf32, #tpu.memory_space<smem>>
    %335 = vector.broadcast %334 : f32 to vector<1x128xf32>
    %336 = arith.mulf %328, %335 : vector<1x128xf32>
    %337 = arith.addf %288, %336 : vector<1x128xf32>
    %c6_169 = arith.constant 6 : index
    %c2_170 = arith.constant 2 : index
    %338 = memref.load %arg4[%c6_169, %c2_170] : memref<16x4xf32, #tpu.memory_space<smem>>
    %339 = vector.broadcast %338 : f32 to vector<1x128xf32>
    %340 = arith.mulf %328, %339 : vector<1x128xf32>
    %341 = arith.addf %292, %340 : vector<1x128xf32>
    %c6_171 = arith.constant 6 : index
    %c3_172 = arith.constant 3 : index
    %342 = memref.load %arg4[%c6_171, %c3_172] : memref<16x4xf32, #tpu.memory_space<smem>>
    %343 = vector.broadcast %342 : f32 to vector<1x128xf32>
    %344 = arith.mulf %328, %343 : vector<1x128xf32>
    %345 = arith.addf %296, %344 : vector<1x128xf32>
    %c7 = arith.constant 7 : index
    %c0_173 = arith.constant 0 : index
    %346 = memref.load %arg2[%c7, %c0_173] : memref<16x4xf32, #tpu.memory_space<smem>>
    %347 = vector.broadcast %346 : f32 to vector<1x128xf32>
    %348 = arith.subf %1, %347 : vector<1x128xf32>
    %349 = arith.mulf %348, %348 : vector<1x128xf32>
    %c7_174 = arith.constant 7 : index
    %c0_175 = arith.constant 0 : index
    %350 = memref.load %arg3[%c7_174, %c0_175] : memref<16x4xf32, #tpu.memory_space<smem>>
    %351 = vector.broadcast %350 : f32 to vector<1x128xf32>
    %352 = arith.mulf %349, %351 : vector<1x128xf32>
    %c7_176 = arith.constant 7 : index
    %c1_177 = arith.constant 1 : index
    %353 = memref.load %arg2[%c7_176, %c1_177] : memref<16x4xf32, #tpu.memory_space<smem>>
    %354 = vector.broadcast %353 : f32 to vector<1x128xf32>
    %355 = arith.subf %3, %354 : vector<1x128xf32>
    %356 = arith.mulf %355, %355 : vector<1x128xf32>
    %c7_178 = arith.constant 7 : index
    %c1_179 = arith.constant 1 : index
    %357 = memref.load %arg3[%c7_178, %c1_179] : memref<16x4xf32, #tpu.memory_space<smem>>
    %358 = vector.broadcast %357 : f32 to vector<1x128xf32>
    %359 = arith.mulf %356, %358 : vector<1x128xf32>
    %360 = arith.minimumf %352, %359 : vector<1x128xf32>
    %c7_180 = arith.constant 7 : index
    %c2_181 = arith.constant 2 : index
    %361 = memref.load %arg2[%c7_180, %c2_181] : memref<16x4xf32, #tpu.memory_space<smem>>
    %362 = vector.broadcast %361 : f32 to vector<1x128xf32>
    %363 = arith.subf %5, %362 : vector<1x128xf32>
    %364 = arith.mulf %363, %363 : vector<1x128xf32>
    %c7_182 = arith.constant 7 : index
    %c2_183 = arith.constant 2 : index
    %365 = memref.load %arg3[%c7_182, %c2_183] : memref<16x4xf32, #tpu.memory_space<smem>>
    %366 = vector.broadcast %365 : f32 to vector<1x128xf32>
    %367 = arith.mulf %364, %366 : vector<1x128xf32>
    %368 = arith.minimumf %360, %367 : vector<1x128xf32>
    %c7_184 = arith.constant 7 : index
    %c3_185 = arith.constant 3 : index
    %369 = memref.load %arg2[%c7_184, %c3_185] : memref<16x4xf32, #tpu.memory_space<smem>>
    %370 = vector.broadcast %369 : f32 to vector<1x128xf32>
    %371 = arith.subf %7, %370 : vector<1x128xf32>
    %372 = arith.mulf %371, %371 : vector<1x128xf32>
    %c7_186 = arith.constant 7 : index
    %c3_187 = arith.constant 3 : index
    %373 = memref.load %arg3[%c7_186, %c3_187] : memref<16x4xf32, #tpu.memory_space<smem>>
    %374 = vector.broadcast %373 : f32 to vector<1x128xf32>
    %375 = arith.mulf %372, %374 : vector<1x128xf32>
    %376 = arith.minimumf %368, %375 : vector<1x128xf32>
    %377 = math.exp %376 : vector<1x128xf32>
    %378 = arith.addf %329, %377 : vector<1x128xf32>
    %c7_188 = arith.constant 7 : index
    %c0_189 = arith.constant 0 : index
    %379 = memref.load %arg4[%c7_188, %c0_189] : memref<16x4xf32, #tpu.memory_space<smem>>
    %380 = vector.broadcast %379 : f32 to vector<1x128xf32>
    %381 = arith.mulf %377, %380 : vector<1x128xf32>
    %382 = arith.addf %333, %381 : vector<1x128xf32>
    %c7_190 = arith.constant 7 : index
    %c1_191 = arith.constant 1 : index
    %383 = memref.load %arg4[%c7_190, %c1_191] : memref<16x4xf32, #tpu.memory_space<smem>>
    %384 = vector.broadcast %383 : f32 to vector<1x128xf32>
    %385 = arith.mulf %377, %384 : vector<1x128xf32>
    %386 = arith.addf %337, %385 : vector<1x128xf32>
    %c7_192 = arith.constant 7 : index
    %c2_193 = arith.constant 2 : index
    %387 = memref.load %arg4[%c7_192, %c2_193] : memref<16x4xf32, #tpu.memory_space<smem>>
    %388 = vector.broadcast %387 : f32 to vector<1x128xf32>
    %389 = arith.mulf %377, %388 : vector<1x128xf32>
    %390 = arith.addf %341, %389 : vector<1x128xf32>
    %c7_194 = arith.constant 7 : index
    %c3_195 = arith.constant 3 : index
    %391 = memref.load %arg4[%c7_194, %c3_195] : memref<16x4xf32, #tpu.memory_space<smem>>
    %392 = vector.broadcast %391 : f32 to vector<1x128xf32>
    %393 = arith.mulf %377, %392 : vector<1x128xf32>
    %394 = arith.addf %345, %393 : vector<1x128xf32>
    %c8 = arith.constant 8 : index
    %c0_196 = arith.constant 0 : index
    %395 = memref.load %arg2[%c8, %c0_196] : memref<16x4xf32, #tpu.memory_space<smem>>
    %396 = vector.broadcast %395 : f32 to vector<1x128xf32>
    %397 = arith.subf %1, %396 : vector<1x128xf32>
    %398 = arith.mulf %397, %397 : vector<1x128xf32>
    %c8_197 = arith.constant 8 : index
    %c0_198 = arith.constant 0 : index
    %399 = memref.load %arg3[%c8_197, %c0_198] : memref<16x4xf32, #tpu.memory_space<smem>>
    %400 = vector.broadcast %399 : f32 to vector<1x128xf32>
    %401 = arith.mulf %398, %400 : vector<1x128xf32>
    %c8_199 = arith.constant 8 : index
    %c1_200 = arith.constant 1 : index
    %402 = memref.load %arg2[%c8_199, %c1_200] : memref<16x4xf32, #tpu.memory_space<smem>>
    %403 = vector.broadcast %402 : f32 to vector<1x128xf32>
    %404 = arith.subf %3, %403 : vector<1x128xf32>
    %405 = arith.mulf %404, %404 : vector<1x128xf32>
    %c8_201 = arith.constant 8 : index
    %c1_202 = arith.constant 1 : index
    %406 = memref.load %arg3[%c8_201, %c1_202] : memref<16x4xf32, #tpu.memory_space<smem>>
    %407 = vector.broadcast %406 : f32 to vector<1x128xf32>
    %408 = arith.mulf %405, %407 : vector<1x128xf32>
    %409 = arith.minimumf %401, %408 : vector<1x128xf32>
    %c8_203 = arith.constant 8 : index
    %c2_204 = arith.constant 2 : index
    %410 = memref.load %arg2[%c8_203, %c2_204] : memref<16x4xf32, #tpu.memory_space<smem>>
    %411 = vector.broadcast %410 : f32 to vector<1x128xf32>
    %412 = arith.subf %5, %411 : vector<1x128xf32>
    %413 = arith.mulf %412, %412 : vector<1x128xf32>
    %c8_205 = arith.constant 8 : index
    %c2_206 = arith.constant 2 : index
    %414 = memref.load %arg3[%c8_205, %c2_206] : memref<16x4xf32, #tpu.memory_space<smem>>
    %415 = vector.broadcast %414 : f32 to vector<1x128xf32>
    %416 = arith.mulf %413, %415 : vector<1x128xf32>
    %417 = arith.minimumf %409, %416 : vector<1x128xf32>
    %c8_207 = arith.constant 8 : index
    %c3_208 = arith.constant 3 : index
    %418 = memref.load %arg2[%c8_207, %c3_208] : memref<16x4xf32, #tpu.memory_space<smem>>
    %419 = vector.broadcast %418 : f32 to vector<1x128xf32>
    %420 = arith.subf %7, %419 : vector<1x128xf32>
    %421 = arith.mulf %420, %420 : vector<1x128xf32>
    %c8_209 = arith.constant 8 : index
    %c3_210 = arith.constant 3 : index
    %422 = memref.load %arg3[%c8_209, %c3_210] : memref<16x4xf32, #tpu.memory_space<smem>>
    %423 = vector.broadcast %422 : f32 to vector<1x128xf32>
    %424 = arith.mulf %421, %423 : vector<1x128xf32>
    %425 = arith.minimumf %417, %424 : vector<1x128xf32>
    %426 = math.exp %425 : vector<1x128xf32>
    %427 = arith.addf %378, %426 : vector<1x128xf32>
    %c8_211 = arith.constant 8 : index
    %c0_212 = arith.constant 0 : index
    %428 = memref.load %arg4[%c8_211, %c0_212] : memref<16x4xf32, #tpu.memory_space<smem>>
    %429 = vector.broadcast %428 : f32 to vector<1x128xf32>
    %430 = arith.mulf %426, %429 : vector<1x128xf32>
    %431 = arith.addf %382, %430 : vector<1x128xf32>
    %c8_213 = arith.constant 8 : index
    %c1_214 = arith.constant 1 : index
    %432 = memref.load %arg4[%c8_213, %c1_214] : memref<16x4xf32, #tpu.memory_space<smem>>
    %433 = vector.broadcast %432 : f32 to vector<1x128xf32>
    %434 = arith.mulf %426, %433 : vector<1x128xf32>
    %435 = arith.addf %386, %434 : vector<1x128xf32>
    %c8_215 = arith.constant 8 : index
    %c2_216 = arith.constant 2 : index
    %436 = memref.load %arg4[%c8_215, %c2_216] : memref<16x4xf32, #tpu.memory_space<smem>>
    %437 = vector.broadcast %436 : f32 to vector<1x128xf32>
    %438 = arith.mulf %426, %437 : vector<1x128xf32>
    %439 = arith.addf %390, %438 : vector<1x128xf32>
    %c8_217 = arith.constant 8 : index
    %c3_218 = arith.constant 3 : index
    %440 = memref.load %arg4[%c8_217, %c3_218] : memref<16x4xf32, #tpu.memory_space<smem>>
    %441 = vector.broadcast %440 : f32 to vector<1x128xf32>
    %442 = arith.mulf %426, %441 : vector<1x128xf32>
    %443 = arith.addf %394, %442 : vector<1x128xf32>
    %c9 = arith.constant 9 : index
    %c0_219 = arith.constant 0 : index
    %444 = memref.load %arg2[%c9, %c0_219] : memref<16x4xf32, #tpu.memory_space<smem>>
    %445 = vector.broadcast %444 : f32 to vector<1x128xf32>
    %446 = arith.subf %1, %445 : vector<1x128xf32>
    %447 = arith.mulf %446, %446 : vector<1x128xf32>
    %c9_220 = arith.constant 9 : index
    %c0_221 = arith.constant 0 : index
    %448 = memref.load %arg3[%c9_220, %c0_221] : memref<16x4xf32, #tpu.memory_space<smem>>
    %449 = vector.broadcast %448 : f32 to vector<1x128xf32>
    %450 = arith.mulf %447, %449 : vector<1x128xf32>
    %c9_222 = arith.constant 9 : index
    %c1_223 = arith.constant 1 : index
    %451 = memref.load %arg2[%c9_222, %c1_223] : memref<16x4xf32, #tpu.memory_space<smem>>
    %452 = vector.broadcast %451 : f32 to vector<1x128xf32>
    %453 = arith.subf %3, %452 : vector<1x128xf32>
    %454 = arith.mulf %453, %453 : vector<1x128xf32>
    %c9_224 = arith.constant 9 : index
    %c1_225 = arith.constant 1 : index
    %455 = memref.load %arg3[%c9_224, %c1_225] : memref<16x4xf32, #tpu.memory_space<smem>>
    %456 = vector.broadcast %455 : f32 to vector<1x128xf32>
    %457 = arith.mulf %454, %456 : vector<1x128xf32>
    %458 = arith.minimumf %450, %457 : vector<1x128xf32>
    %c9_226 = arith.constant 9 : index
    %c2_227 = arith.constant 2 : index
    %459 = memref.load %arg2[%c9_226, %c2_227] : memref<16x4xf32, #tpu.memory_space<smem>>
    %460 = vector.broadcast %459 : f32 to vector<1x128xf32>
    %461 = arith.subf %5, %460 : vector<1x128xf32>
    %462 = arith.mulf %461, %461 : vector<1x128xf32>
    %c9_228 = arith.constant 9 : index
    %c2_229 = arith.constant 2 : index
    %463 = memref.load %arg3[%c9_228, %c2_229] : memref<16x4xf32, #tpu.memory_space<smem>>
    %464 = vector.broadcast %463 : f32 to vector<1x128xf32>
    %465 = arith.mulf %462, %464 : vector<1x128xf32>
    %466 = arith.minimumf %458, %465 : vector<1x128xf32>
    %c9_230 = arith.constant 9 : index
    %c3_231 = arith.constant 3 : index
    %467 = memref.load %arg2[%c9_230, %c3_231] : memref<16x4xf32, #tpu.memory_space<smem>>
    %468 = vector.broadcast %467 : f32 to vector<1x128xf32>
    %469 = arith.subf %7, %468 : vector<1x128xf32>
    %470 = arith.mulf %469, %469 : vector<1x128xf32>
    %c9_232 = arith.constant 9 : index
    %c3_233 = arith.constant 3 : index
    %471 = memref.load %arg3[%c9_232, %c3_233] : memref<16x4xf32, #tpu.memory_space<smem>>
    %472 = vector.broadcast %471 : f32 to vector<1x128xf32>
    %473 = arith.mulf %470, %472 : vector<1x128xf32>
    %474 = arith.minimumf %466, %473 : vector<1x128xf32>
    %475 = math.exp %474 : vector<1x128xf32>
    %476 = arith.addf %427, %475 : vector<1x128xf32>
    %c9_234 = arith.constant 9 : index
    %c0_235 = arith.constant 0 : index
    %477 = memref.load %arg4[%c9_234, %c0_235] : memref<16x4xf32, #tpu.memory_space<smem>>
    %478 = vector.broadcast %477 : f32 to vector<1x128xf32>
    %479 = arith.mulf %475, %478 : vector<1x128xf32>
    %480 = arith.addf %431, %479 : vector<1x128xf32>
    %c9_236 = arith.constant 9 : index
    %c1_237 = arith.constant 1 : index
    %481 = memref.load %arg4[%c9_236, %c1_237] : memref<16x4xf32, #tpu.memory_space<smem>>
    %482 = vector.broadcast %481 : f32 to vector<1x128xf32>
    %483 = arith.mulf %475, %482 : vector<1x128xf32>
    %484 = arith.addf %435, %483 : vector<1x128xf32>
    %c9_238 = arith.constant 9 : index
    %c2_239 = arith.constant 2 : index
    %485 = memref.load %arg4[%c9_238, %c2_239] : memref<16x4xf32, #tpu.memory_space<smem>>
    %486 = vector.broadcast %485 : f32 to vector<1x128xf32>
    %487 = arith.mulf %475, %486 : vector<1x128xf32>
    %488 = arith.addf %439, %487 : vector<1x128xf32>
    %c9_240 = arith.constant 9 : index
    %c3_241 = arith.constant 3 : index
    %489 = memref.load %arg4[%c9_240, %c3_241] : memref<16x4xf32, #tpu.memory_space<smem>>
    %490 = vector.broadcast %489 : f32 to vector<1x128xf32>
    %491 = arith.mulf %475, %490 : vector<1x128xf32>
    %492 = arith.addf %443, %491 : vector<1x128xf32>
    %c10 = arith.constant 10 : index
    %c0_242 = arith.constant 0 : index
    %493 = memref.load %arg2[%c10, %c0_242] : memref<16x4xf32, #tpu.memory_space<smem>>
    %494 = vector.broadcast %493 : f32 to vector<1x128xf32>
    %495 = arith.subf %1, %494 : vector<1x128xf32>
    %496 = arith.mulf %495, %495 : vector<1x128xf32>
    %c10_243 = arith.constant 10 : index
    %c0_244 = arith.constant 0 : index
    %497 = memref.load %arg3[%c10_243, %c0_244] : memref<16x4xf32, #tpu.memory_space<smem>>
    %498 = vector.broadcast %497 : f32 to vector<1x128xf32>
    %499 = arith.mulf %496, %498 : vector<1x128xf32>
    %c10_245 = arith.constant 10 : index
    %c1_246 = arith.constant 1 : index
    %500 = memref.load %arg2[%c10_245, %c1_246] : memref<16x4xf32, #tpu.memory_space<smem>>
    %501 = vector.broadcast %500 : f32 to vector<1x128xf32>
    %502 = arith.subf %3, %501 : vector<1x128xf32>
    %503 = arith.mulf %502, %502 : vector<1x128xf32>
    %c10_247 = arith.constant 10 : index
    %c1_248 = arith.constant 1 : index
    %504 = memref.load %arg3[%c10_247, %c1_248] : memref<16x4xf32, #tpu.memory_space<smem>>
    %505 = vector.broadcast %504 : f32 to vector<1x128xf32>
    %506 = arith.mulf %503, %505 : vector<1x128xf32>
    %507 = arith.minimumf %499, %506 : vector<1x128xf32>
    %c10_249 = arith.constant 10 : index
    %c2_250 = arith.constant 2 : index
    %508 = memref.load %arg2[%c10_249, %c2_250] : memref<16x4xf32, #tpu.memory_space<smem>>
    %509 = vector.broadcast %508 : f32 to vector<1x128xf32>
    %510 = arith.subf %5, %509 : vector<1x128xf32>
    %511 = arith.mulf %510, %510 : vector<1x128xf32>
    %c10_251 = arith.constant 10 : index
    %c2_252 = arith.constant 2 : index
    %512 = memref.load %arg3[%c10_251, %c2_252] : memref<16x4xf32, #tpu.memory_space<smem>>
    %513 = vector.broadcast %512 : f32 to vector<1x128xf32>
    %514 = arith.mulf %511, %513 : vector<1x128xf32>
    %515 = arith.minimumf %507, %514 : vector<1x128xf32>
    %c10_253 = arith.constant 10 : index
    %c3_254 = arith.constant 3 : index
    %516 = memref.load %arg2[%c10_253, %c3_254] : memref<16x4xf32, #tpu.memory_space<smem>>
    %517 = vector.broadcast %516 : f32 to vector<1x128xf32>
    %518 = arith.subf %7, %517 : vector<1x128xf32>
    %519 = arith.mulf %518, %518 : vector<1x128xf32>
    %c10_255 = arith.constant 10 : index
    %c3_256 = arith.constant 3 : index
    %520 = memref.load %arg3[%c10_255, %c3_256] : memref<16x4xf32, #tpu.memory_space<smem>>
    %521 = vector.broadcast %520 : f32 to vector<1x128xf32>
    %522 = arith.mulf %519, %521 : vector<1x128xf32>
    %523 = arith.minimumf %515, %522 : vector<1x128xf32>
    %524 = math.exp %523 : vector<1x128xf32>
    %525 = arith.addf %476, %524 : vector<1x128xf32>
    %c10_257 = arith.constant 10 : index
    %c0_258 = arith.constant 0 : index
    %526 = memref.load %arg4[%c10_257, %c0_258] : memref<16x4xf32, #tpu.memory_space<smem>>
    %527 = vector.broadcast %526 : f32 to vector<1x128xf32>
    %528 = arith.mulf %524, %527 : vector<1x128xf32>
    %529 = arith.addf %480, %528 : vector<1x128xf32>
    %c10_259 = arith.constant 10 : index
    %c1_260 = arith.constant 1 : index
    %530 = memref.load %arg4[%c10_259, %c1_260] : memref<16x4xf32, #tpu.memory_space<smem>>
    %531 = vector.broadcast %530 : f32 to vector<1x128xf32>
    %532 = arith.mulf %524, %531 : vector<1x128xf32>
    %533 = arith.addf %484, %532 : vector<1x128xf32>
    %c10_261 = arith.constant 10 : index
    %c2_262 = arith.constant 2 : index
    %534 = memref.load %arg4[%c10_261, %c2_262] : memref<16x4xf32, #tpu.memory_space<smem>>
    %535 = vector.broadcast %534 : f32 to vector<1x128xf32>
    %536 = arith.mulf %524, %535 : vector<1x128xf32>
    %537 = arith.addf %488, %536 : vector<1x128xf32>
    %c10_263 = arith.constant 10 : index
    %c3_264 = arith.constant 3 : index
    %538 = memref.load %arg4[%c10_263, %c3_264] : memref<16x4xf32, #tpu.memory_space<smem>>
    %539 = vector.broadcast %538 : f32 to vector<1x128xf32>
    %540 = arith.mulf %524, %539 : vector<1x128xf32>
    %541 = arith.addf %492, %540 : vector<1x128xf32>
    %c11 = arith.constant 11 : index
    %c0_265 = arith.constant 0 : index
    %542 = memref.load %arg2[%c11, %c0_265] : memref<16x4xf32, #tpu.memory_space<smem>>
    %543 = vector.broadcast %542 : f32 to vector<1x128xf32>
    %544 = arith.subf %1, %543 : vector<1x128xf32>
    %545 = arith.mulf %544, %544 : vector<1x128xf32>
    %c11_266 = arith.constant 11 : index
    %c0_267 = arith.constant 0 : index
    %546 = memref.load %arg3[%c11_266, %c0_267] : memref<16x4xf32, #tpu.memory_space<smem>>
    %547 = vector.broadcast %546 : f32 to vector<1x128xf32>
    %548 = arith.mulf %545, %547 : vector<1x128xf32>
    %c11_268 = arith.constant 11 : index
    %c1_269 = arith.constant 1 : index
    %549 = memref.load %arg2[%c11_268, %c1_269] : memref<16x4xf32, #tpu.memory_space<smem>>
    %550 = vector.broadcast %549 : f32 to vector<1x128xf32>
    %551 = arith.subf %3, %550 : vector<1x128xf32>
    %552 = arith.mulf %551, %551 : vector<1x128xf32>
    %c11_270 = arith.constant 11 : index
    %c1_271 = arith.constant 1 : index
    %553 = memref.load %arg3[%c11_270, %c1_271] : memref<16x4xf32, #tpu.memory_space<smem>>
    %554 = vector.broadcast %553 : f32 to vector<1x128xf32>
    %555 = arith.mulf %552, %554 : vector<1x128xf32>
    %556 = arith.minimumf %548, %555 : vector<1x128xf32>
    %c11_272 = arith.constant 11 : index
    %c2_273 = arith.constant 2 : index
    %557 = memref.load %arg2[%c11_272, %c2_273] : memref<16x4xf32, #tpu.memory_space<smem>>
    %558 = vector.broadcast %557 : f32 to vector<1x128xf32>
    %559 = arith.subf %5, %558 : vector<1x128xf32>
    %560 = arith.mulf %559, %559 : vector<1x128xf32>
    %c11_274 = arith.constant 11 : index
    %c2_275 = arith.constant 2 : index
    %561 = memref.load %arg3[%c11_274, %c2_275] : memref<16x4xf32, #tpu.memory_space<smem>>
    %562 = vector.broadcast %561 : f32 to vector<1x128xf32>
    %563 = arith.mulf %560, %562 : vector<1x128xf32>
    %564 = arith.minimumf %556, %563 : vector<1x128xf32>
    %c11_276 = arith.constant 11 : index
    %c3_277 = arith.constant 3 : index
    %565 = memref.load %arg2[%c11_276, %c3_277] : memref<16x4xf32, #tpu.memory_space<smem>>
    %566 = vector.broadcast %565 : f32 to vector<1x128xf32>
    %567 = arith.subf %7, %566 : vector<1x128xf32>
    %568 = arith.mulf %567, %567 : vector<1x128xf32>
    %c11_278 = arith.constant 11 : index
    %c3_279 = arith.constant 3 : index
    %569 = memref.load %arg3[%c11_278, %c3_279] : memref<16x4xf32, #tpu.memory_space<smem>>
    %570 = vector.broadcast %569 : f32 to vector<1x128xf32>
    %571 = arith.mulf %568, %570 : vector<1x128xf32>
    %572 = arith.minimumf %564, %571 : vector<1x128xf32>
    %573 = math.exp %572 : vector<1x128xf32>
    %574 = arith.addf %525, %573 : vector<1x128xf32>
    %c11_280 = arith.constant 11 : index
    %c0_281 = arith.constant 0 : index
    %575 = memref.load %arg4[%c11_280, %c0_281] : memref<16x4xf32, #tpu.memory_space<smem>>
    %576 = vector.broadcast %575 : f32 to vector<1x128xf32>
    %577 = arith.mulf %573, %576 : vector<1x128xf32>
    %578 = arith.addf %529, %577 : vector<1x128xf32>
    %c11_282 = arith.constant 11 : index
    %c1_283 = arith.constant 1 : index
    %579 = memref.load %arg4[%c11_282, %c1_283] : memref<16x4xf32, #tpu.memory_space<smem>>
    %580 = vector.broadcast %579 : f32 to vector<1x128xf32>
    %581 = arith.mulf %573, %580 : vector<1x128xf32>
    %582 = arith.addf %533, %581 : vector<1x128xf32>
    %c11_284 = arith.constant 11 : index
    %c2_285 = arith.constant 2 : index
    %583 = memref.load %arg4[%c11_284, %c2_285] : memref<16x4xf32, #tpu.memory_space<smem>>
    %584 = vector.broadcast %583 : f32 to vector<1x128xf32>
    %585 = arith.mulf %573, %584 : vector<1x128xf32>
    %586 = arith.addf %537, %585 : vector<1x128xf32>
    %c11_286 = arith.constant 11 : index
    %c3_287 = arith.constant 3 : index
    %587 = memref.load %arg4[%c11_286, %c3_287] : memref<16x4xf32, #tpu.memory_space<smem>>
    %588 = vector.broadcast %587 : f32 to vector<1x128xf32>
    %589 = arith.mulf %573, %588 : vector<1x128xf32>
    %590 = arith.addf %541, %589 : vector<1x128xf32>
    %c12 = arith.constant 12 : index
    %c0_288 = arith.constant 0 : index
    %591 = memref.load %arg2[%c12, %c0_288] : memref<16x4xf32, #tpu.memory_space<smem>>
    %592 = vector.broadcast %591 : f32 to vector<1x128xf32>
    %593 = arith.subf %1, %592 : vector<1x128xf32>
    %594 = arith.mulf %593, %593 : vector<1x128xf32>
    %c12_289 = arith.constant 12 : index
    %c0_290 = arith.constant 0 : index
    %595 = memref.load %arg3[%c12_289, %c0_290] : memref<16x4xf32, #tpu.memory_space<smem>>
    %596 = vector.broadcast %595 : f32 to vector<1x128xf32>
    %597 = arith.mulf %594, %596 : vector<1x128xf32>
    %c12_291 = arith.constant 12 : index
    %c1_292 = arith.constant 1 : index
    %598 = memref.load %arg2[%c12_291, %c1_292] : memref<16x4xf32, #tpu.memory_space<smem>>
    %599 = vector.broadcast %598 : f32 to vector<1x128xf32>
    %600 = arith.subf %3, %599 : vector<1x128xf32>
    %601 = arith.mulf %600, %600 : vector<1x128xf32>
    %c12_293 = arith.constant 12 : index
    %c1_294 = arith.constant 1 : index
    %602 = memref.load %arg3[%c12_293, %c1_294] : memref<16x4xf32, #tpu.memory_space<smem>>
    %603 = vector.broadcast %602 : f32 to vector<1x128xf32>
    %604 = arith.mulf %601, %603 : vector<1x128xf32>
    %605 = arith.minimumf %597, %604 : vector<1x128xf32>
    %c12_295 = arith.constant 12 : index
    %c2_296 = arith.constant 2 : index
    %606 = memref.load %arg2[%c12_295, %c2_296] : memref<16x4xf32, #tpu.memory_space<smem>>
    %607 = vector.broadcast %606 : f32 to vector<1x128xf32>
    %608 = arith.subf %5, %607 : vector<1x128xf32>
    %609 = arith.mulf %608, %608 : vector<1x128xf32>
    %c12_297 = arith.constant 12 : index
    %c2_298 = arith.constant 2 : index
    %610 = memref.load %arg3[%c12_297, %c2_298] : memref<16x4xf32, #tpu.memory_space<smem>>
    %611 = vector.broadcast %610 : f32 to vector<1x128xf32>
    %612 = arith.mulf %609, %611 : vector<1x128xf32>
    %613 = arith.minimumf %605, %612 : vector<1x128xf32>
    %c12_299 = arith.constant 12 : index
    %c3_300 = arith.constant 3 : index
    %614 = memref.load %arg2[%c12_299, %c3_300] : memref<16x4xf32, #tpu.memory_space<smem>>
    %615 = vector.broadcast %614 : f32 to vector<1x128xf32>
    %616 = arith.subf %7, %615 : vector<1x128xf32>
    %617 = arith.mulf %616, %616 : vector<1x128xf32>
    %c12_301 = arith.constant 12 : index
    %c3_302 = arith.constant 3 : index
    %618 = memref.load %arg3[%c12_301, %c3_302] : memref<16x4xf32, #tpu.memory_space<smem>>
    %619 = vector.broadcast %618 : f32 to vector<1x128xf32>
    %620 = arith.mulf %617, %619 : vector<1x128xf32>
    %621 = arith.minimumf %613, %620 : vector<1x128xf32>
    %622 = math.exp %621 : vector<1x128xf32>
    %623 = arith.addf %574, %622 : vector<1x128xf32>
    %c12_303 = arith.constant 12 : index
    %c0_304 = arith.constant 0 : index
    %624 = memref.load %arg4[%c12_303, %c0_304] : memref<16x4xf32, #tpu.memory_space<smem>>
    %625 = vector.broadcast %624 : f32 to vector<1x128xf32>
    %626 = arith.mulf %622, %625 : vector<1x128xf32>
    %627 = arith.addf %578, %626 : vector<1x128xf32>
    %c12_305 = arith.constant 12 : index
    %c1_306 = arith.constant 1 : index
    %628 = memref.load %arg4[%c12_305, %c1_306] : memref<16x4xf32, #tpu.memory_space<smem>>
    %629 = vector.broadcast %628 : f32 to vector<1x128xf32>
    %630 = arith.mulf %622, %629 : vector<1x128xf32>
    %631 = arith.addf %582, %630 : vector<1x128xf32>
    %c12_307 = arith.constant 12 : index
    %c2_308 = arith.constant 2 : index
    %632 = memref.load %arg4[%c12_307, %c2_308] : memref<16x4xf32, #tpu.memory_space<smem>>
    %633 = vector.broadcast %632 : f32 to vector<1x128xf32>
    %634 = arith.mulf %622, %633 : vector<1x128xf32>
    %635 = arith.addf %586, %634 : vector<1x128xf32>
    %c12_309 = arith.constant 12 : index
    %c3_310 = arith.constant 3 : index
    %636 = memref.load %arg4[%c12_309, %c3_310] : memref<16x4xf32, #tpu.memory_space<smem>>
    %637 = vector.broadcast %636 : f32 to vector<1x128xf32>
    %638 = arith.mulf %622, %637 : vector<1x128xf32>
    %639 = arith.addf %590, %638 : vector<1x128xf32>
    %c13 = arith.constant 13 : index
    %c0_311 = arith.constant 0 : index
    %640 = memref.load %arg2[%c13, %c0_311] : memref<16x4xf32, #tpu.memory_space<smem>>
    %641 = vector.broadcast %640 : f32 to vector<1x128xf32>
    %642 = arith.subf %1, %641 : vector<1x128xf32>
    %643 = arith.mulf %642, %642 : vector<1x128xf32>
    %c13_312 = arith.constant 13 : index
    %c0_313 = arith.constant 0 : index
    %644 = memref.load %arg3[%c13_312, %c0_313] : memref<16x4xf32, #tpu.memory_space<smem>>
    %645 = vector.broadcast %644 : f32 to vector<1x128xf32>
    %646 = arith.mulf %643, %645 : vector<1x128xf32>
    %c13_314 = arith.constant 13 : index
    %c1_315 = arith.constant 1 : index
    %647 = memref.load %arg2[%c13_314, %c1_315] : memref<16x4xf32, #tpu.memory_space<smem>>
    %648 = vector.broadcast %647 : f32 to vector<1x128xf32>
    %649 = arith.subf %3, %648 : vector<1x128xf32>
    %650 = arith.mulf %649, %649 : vector<1x128xf32>
    %c13_316 = arith.constant 13 : index
    %c1_317 = arith.constant 1 : index
    %651 = memref.load %arg3[%c13_316, %c1_317] : memref<16x4xf32, #tpu.memory_space<smem>>
    %652 = vector.broadcast %651 : f32 to vector<1x128xf32>
    %653 = arith.mulf %650, %652 : vector<1x128xf32>
    %654 = arith.minimumf %646, %653 : vector<1x128xf32>
    %c13_318 = arith.constant 13 : index
    %c2_319 = arith.constant 2 : index
    %655 = memref.load %arg2[%c13_318, %c2_319] : memref<16x4xf32, #tpu.memory_space<smem>>
    %656 = vector.broadcast %655 : f32 to vector<1x128xf32>
    %657 = arith.subf %5, %656 : vector<1x128xf32>
    %658 = arith.mulf %657, %657 : vector<1x128xf32>
    %c13_320 = arith.constant 13 : index
    %c2_321 = arith.constant 2 : index
    %659 = memref.load %arg3[%c13_320, %c2_321] : memref<16x4xf32, #tpu.memory_space<smem>>
    %660 = vector.broadcast %659 : f32 to vector<1x128xf32>
    %661 = arith.mulf %658, %660 : vector<1x128xf32>
    %662 = arith.minimumf %654, %661 : vector<1x128xf32>
    %c13_322 = arith.constant 13 : index
    %c3_323 = arith.constant 3 : index
    %663 = memref.load %arg2[%c13_322, %c3_323] : memref<16x4xf32, #tpu.memory_space<smem>>
    %664 = vector.broadcast %663 : f32 to vector<1x128xf32>
    %665 = arith.subf %7, %664 : vector<1x128xf32>
    %666 = arith.mulf %665, %665 : vector<1x128xf32>
    %c13_324 = arith.constant 13 : index
    %c3_325 = arith.constant 3 : index
    %667 = memref.load %arg3[%c13_324, %c3_325] : memref<16x4xf32, #tpu.memory_space<smem>>
    %668 = vector.broadcast %667 : f32 to vector<1x128xf32>
    %669 = arith.mulf %666, %668 : vector<1x128xf32>
    %670 = arith.minimumf %662, %669 : vector<1x128xf32>
    %671 = math.exp %670 : vector<1x128xf32>
    %672 = arith.addf %623, %671 : vector<1x128xf32>
    %c13_326 = arith.constant 13 : index
    %c0_327 = arith.constant 0 : index
    %673 = memref.load %arg4[%c13_326, %c0_327] : memref<16x4xf32, #tpu.memory_space<smem>>
    %674 = vector.broadcast %673 : f32 to vector<1x128xf32>
    %675 = arith.mulf %671, %674 : vector<1x128xf32>
    %676 = arith.addf %627, %675 : vector<1x128xf32>
    %c13_328 = arith.constant 13 : index
    %c1_329 = arith.constant 1 : index
    %677 = memref.load %arg4[%c13_328, %c1_329] : memref<16x4xf32, #tpu.memory_space<smem>>
    %678 = vector.broadcast %677 : f32 to vector<1x128xf32>
    %679 = arith.mulf %671, %678 : vector<1x128xf32>
    %680 = arith.addf %631, %679 : vector<1x128xf32>
    %c13_330 = arith.constant 13 : index
    %c2_331 = arith.constant 2 : index
    %681 = memref.load %arg4[%c13_330, %c2_331] : memref<16x4xf32, #tpu.memory_space<smem>>
    %682 = vector.broadcast %681 : f32 to vector<1x128xf32>
    %683 = arith.mulf %671, %682 : vector<1x128xf32>
    %684 = arith.addf %635, %683 : vector<1x128xf32>
    %c13_332 = arith.constant 13 : index
    %c3_333 = arith.constant 3 : index
    %685 = memref.load %arg4[%c13_332, %c3_333] : memref<16x4xf32, #tpu.memory_space<smem>>
    %686 = vector.broadcast %685 : f32 to vector<1x128xf32>
    %687 = arith.mulf %671, %686 : vector<1x128xf32>
    %688 = arith.addf %639, %687 : vector<1x128xf32>
    %c14 = arith.constant 14 : index
    %c0_334 = arith.constant 0 : index
    %689 = memref.load %arg2[%c14, %c0_334] : memref<16x4xf32, #tpu.memory_space<smem>>
    %690 = vector.broadcast %689 : f32 to vector<1x128xf32>
    %691 = arith.subf %1, %690 : vector<1x128xf32>
    %692 = arith.mulf %691, %691 : vector<1x128xf32>
    %c14_335 = arith.constant 14 : index
    %c0_336 = arith.constant 0 : index
    %693 = memref.load %arg3[%c14_335, %c0_336] : memref<16x4xf32, #tpu.memory_space<smem>>
    %694 = vector.broadcast %693 : f32 to vector<1x128xf32>
    %695 = arith.mulf %692, %694 : vector<1x128xf32>
    %c14_337 = arith.constant 14 : index
    %c1_338 = arith.constant 1 : index
    %696 = memref.load %arg2[%c14_337, %c1_338] : memref<16x4xf32, #tpu.memory_space<smem>>
    %697 = vector.broadcast %696 : f32 to vector<1x128xf32>
    %698 = arith.subf %3, %697 : vector<1x128xf32>
    %699 = arith.mulf %698, %698 : vector<1x128xf32>
    %c14_339 = arith.constant 14 : index
    %c1_340 = arith.constant 1 : index
    %700 = memref.load %arg3[%c14_339, %c1_340] : memref<16x4xf32, #tpu.memory_space<smem>>
    %701 = vector.broadcast %700 : f32 to vector<1x128xf32>
    %702 = arith.mulf %699, %701 : vector<1x128xf32>
    %703 = arith.minimumf %695, %702 : vector<1x128xf32>
    %c14_341 = arith.constant 14 : index
    %c2_342 = arith.constant 2 : index
    %704 = memref.load %arg2[%c14_341, %c2_342] : memref<16x4xf32, #tpu.memory_space<smem>>
    %705 = vector.broadcast %704 : f32 to vector<1x128xf32>
    %706 = arith.subf %5, %705 : vector<1x128xf32>
    %707 = arith.mulf %706, %706 : vector<1x128xf32>
    %c14_343 = arith.constant 14 : index
    %c2_344 = arith.constant 2 : index
    %708 = memref.load %arg3[%c14_343, %c2_344] : memref<16x4xf32, #tpu.memory_space<smem>>
    %709 = vector.broadcast %708 : f32 to vector<1x128xf32>
    %710 = arith.mulf %707, %709 : vector<1x128xf32>
    %711 = arith.minimumf %703, %710 : vector<1x128xf32>
    %c14_345 = arith.constant 14 : index
    %c3_346 = arith.constant 3 : index
    %712 = memref.load %arg2[%c14_345, %c3_346] : memref<16x4xf32, #tpu.memory_space<smem>>
    %713 = vector.broadcast %712 : f32 to vector<1x128xf32>
    %714 = arith.subf %7, %713 : vector<1x128xf32>
    %715 = arith.mulf %714, %714 : vector<1x128xf32>
    %c14_347 = arith.constant 14 : index
    %c3_348 = arith.constant 3 : index
    %716 = memref.load %arg3[%c14_347, %c3_348] : memref<16x4xf32, #tpu.memory_space<smem>>
    %717 = vector.broadcast %716 : f32 to vector<1x128xf32>
    %718 = arith.mulf %715, %717 : vector<1x128xf32>
    %719 = arith.minimumf %711, %718 : vector<1x128xf32>
    %720 = math.exp %719 : vector<1x128xf32>
    %721 = arith.addf %672, %720 : vector<1x128xf32>
    %c14_349 = arith.constant 14 : index
    %c0_350 = arith.constant 0 : index
    %722 = memref.load %arg4[%c14_349, %c0_350] : memref<16x4xf32, #tpu.memory_space<smem>>
    %723 = vector.broadcast %722 : f32 to vector<1x128xf32>
    %724 = arith.mulf %720, %723 : vector<1x128xf32>
    %725 = arith.addf %676, %724 : vector<1x128xf32>
    %c14_351 = arith.constant 14 : index
    %c1_352 = arith.constant 1 : index
    %726 = memref.load %arg4[%c14_351, %c1_352] : memref<16x4xf32, #tpu.memory_space<smem>>
    %727 = vector.broadcast %726 : f32 to vector<1x128xf32>
    %728 = arith.mulf %720, %727 : vector<1x128xf32>
    %729 = arith.addf %680, %728 : vector<1x128xf32>
    %c14_353 = arith.constant 14 : index
    %c2_354 = arith.constant 2 : index
    %730 = memref.load %arg4[%c14_353, %c2_354] : memref<16x4xf32, #tpu.memory_space<smem>>
    %731 = vector.broadcast %730 : f32 to vector<1x128xf32>
    %732 = arith.mulf %720, %731 : vector<1x128xf32>
    %733 = arith.addf %684, %732 : vector<1x128xf32>
    %c14_355 = arith.constant 14 : index
    %c3_356 = arith.constant 3 : index
    %734 = memref.load %arg4[%c14_355, %c3_356] : memref<16x4xf32, #tpu.memory_space<smem>>
    %735 = vector.broadcast %734 : f32 to vector<1x128xf32>
    %736 = arith.mulf %720, %735 : vector<1x128xf32>
    %737 = arith.addf %688, %736 : vector<1x128xf32>
    %c15 = arith.constant 15 : index
    %c0_357 = arith.constant 0 : index
    %738 = memref.load %arg2[%c15, %c0_357] : memref<16x4xf32, #tpu.memory_space<smem>>
    %739 = vector.broadcast %738 : f32 to vector<1x128xf32>
    %740 = arith.subf %1, %739 : vector<1x128xf32>
    %741 = arith.mulf %740, %740 : vector<1x128xf32>
    %c15_358 = arith.constant 15 : index
    %c0_359 = arith.constant 0 : index
    %742 = memref.load %arg3[%c15_358, %c0_359] : memref<16x4xf32, #tpu.memory_space<smem>>
    %743 = vector.broadcast %742 : f32 to vector<1x128xf32>
    %744 = arith.mulf %741, %743 : vector<1x128xf32>
    %c15_360 = arith.constant 15 : index
    %c1_361 = arith.constant 1 : index
    %745 = memref.load %arg2[%c15_360, %c1_361] : memref<16x4xf32, #tpu.memory_space<smem>>
    %746 = vector.broadcast %745 : f32 to vector<1x128xf32>
    %747 = arith.subf %3, %746 : vector<1x128xf32>
    %748 = arith.mulf %747, %747 : vector<1x128xf32>
    %c15_362 = arith.constant 15 : index
    %c1_363 = arith.constant 1 : index
    %749 = memref.load %arg3[%c15_362, %c1_363] : memref<16x4xf32, #tpu.memory_space<smem>>
    %750 = vector.broadcast %749 : f32 to vector<1x128xf32>
    %751 = arith.mulf %748, %750 : vector<1x128xf32>
    %752 = arith.minimumf %744, %751 : vector<1x128xf32>
    %c15_364 = arith.constant 15 : index
    %c2_365 = arith.constant 2 : index
    %753 = memref.load %arg2[%c15_364, %c2_365] : memref<16x4xf32, #tpu.memory_space<smem>>
    %754 = vector.broadcast %753 : f32 to vector<1x128xf32>
    %755 = arith.subf %5, %754 : vector<1x128xf32>
    %756 = arith.mulf %755, %755 : vector<1x128xf32>
    %c15_366 = arith.constant 15 : index
    %c2_367 = arith.constant 2 : index
    %757 = memref.load %arg3[%c15_366, %c2_367] : memref<16x4xf32, #tpu.memory_space<smem>>
    %758 = vector.broadcast %757 : f32 to vector<1x128xf32>
    %759 = arith.mulf %756, %758 : vector<1x128xf32>
    %760 = arith.minimumf %752, %759 : vector<1x128xf32>
    %c15_368 = arith.constant 15 : index
    %c3_369 = arith.constant 3 : index
    %761 = memref.load %arg2[%c15_368, %c3_369] : memref<16x4xf32, #tpu.memory_space<smem>>
    %762 = vector.broadcast %761 : f32 to vector<1x128xf32>
    %763 = arith.subf %7, %762 : vector<1x128xf32>
    %764 = arith.mulf %763, %763 : vector<1x128xf32>
    %c15_370 = arith.constant 15 : index
    %c3_371 = arith.constant 3 : index
    %765 = memref.load %arg3[%c15_370, %c3_371] : memref<16x4xf32, #tpu.memory_space<smem>>
    %766 = vector.broadcast %765 : f32 to vector<1x128xf32>
    %767 = arith.mulf %764, %766 : vector<1x128xf32>
    %768 = arith.minimumf %760, %767 : vector<1x128xf32>
    %769 = math.exp %768 : vector<1x128xf32>
    %770 = arith.addf %721, %769 : vector<1x128xf32>
    %c15_372 = arith.constant 15 : index
    %c0_373 = arith.constant 0 : index
    %771 = memref.load %arg4[%c15_372, %c0_373] : memref<16x4xf32, #tpu.memory_space<smem>>
    %772 = vector.broadcast %771 : f32 to vector<1x128xf32>
    %773 = arith.mulf %769, %772 : vector<1x128xf32>
    %774 = arith.addf %725, %773 : vector<1x128xf32>
    %c15_374 = arith.constant 15 : index
    %c1_375 = arith.constant 1 : index
    %775 = memref.load %arg4[%c15_374, %c1_375] : memref<16x4xf32, #tpu.memory_space<smem>>
    %776 = vector.broadcast %775 : f32 to vector<1x128xf32>
    %777 = arith.mulf %769, %776 : vector<1x128xf32>
    %778 = arith.addf %729, %777 : vector<1x128xf32>
    %c15_376 = arith.constant 15 : index
    %c2_377 = arith.constant 2 : index
    %779 = memref.load %arg4[%c15_376, %c2_377] : memref<16x4xf32, #tpu.memory_space<smem>>
    %780 = vector.broadcast %779 : f32 to vector<1x128xf32>
    %781 = arith.mulf %769, %780 : vector<1x128xf32>
    %782 = arith.addf %733, %781 : vector<1x128xf32>
    %c15_378 = arith.constant 15 : index
    %c3_379 = arith.constant 3 : index
    %783 = memref.load %arg4[%c15_378, %c3_379] : memref<16x4xf32, #tpu.memory_space<smem>>
    %784 = vector.broadcast %783 : f32 to vector<1x128xf32>
    %785 = arith.mulf %769, %784 : vector<1x128xf32>
    %786 = arith.addf %737, %785 : vector<1x128xf32>
    %cst = arith.constant 9.99999996E-13 : f32
    %cst_380 = arith.constant 9.99999995E+11 : f32
    %787 = vector.broadcast %cst : f32 to vector<1x128xf32>
    %788 = arith.maximumf %787, %770 : vector<1x128xf32>
    %789 = vector.broadcast %cst_380 : f32 to vector<1x128xf32>
    %790 = arith.minimumf %789, %788 : vector<1x128xf32>
    %791 = tpu.reciprocal %790 : vector<1x128xf32> -> vector<1x128xf32>
    %792 = arith.mulf %774, %791 : vector<1x128xf32>
    %c0_381 = arith.constant 0 : index
    %c0_382 = arith.constant 0 : index
    %c0_383 = arith.constant 0 : index
    %793 = vector.load %arg5[%c0_381, %c0_382, %c0_383] : memref<4x1x128xf32, #tpu.memory_space<vmem>>, vector<1x1x128xf32>
    %794 = vector.shape_cast %793 : vector<1x1x128xf32> to vector<1x128xf32>
    %795 = vector.shape_cast %792 : vector<1x128xf32> to vector<1x1x128xf32>
    tpu.vector_store %arg5[%c0_381, %c0_382, %c0_383], %795 {strides = array<i32>} : memref<4x1x128xf32, #tpu.memory_space<vmem>>, vector<1x1x128xf32>,
    %796 = arith.mulf %778, %791 : vector<1x128xf32>
    %c1_384 = arith.constant 1 : index
    %c0_385 = arith.constant 0 : index
    %c0_386 = arith.constant 0 : index
    %797 = vector.load %arg5[%c1_384, %c0_385, %c0_386] : memref<4x1x128xf32, #tpu.memory_space<vmem>>, vector<1x1x128xf32>
    %798 = vector.shape_cast %797 : vector<1x1x128xf32> to vector<1x128xf32>
    %799 = vector.shape_cast %796 : vector<1x128xf32> to vector<1x1x128xf32>
    tpu.vector_store %arg5[%c1_384, %c0_385, %c0_386], %799 {strides = array<i32>} : memref<4x1x128xf32, #tpu.memory_space<vmem>>, vector<1x1x128xf32>,
    %800 = arith.mulf %782, %791 : vector<1x128xf32>
    %c2_387 = arith.constant 2 : index
    %c0_388 = arith.constant 0 : index
    %c0_389 = arith.constant 0 : index
    %801 = vector.load %arg5[%c2_387, %c0_388, %c0_389] : memref<4x1x128xf32, #tpu.memory_space<vmem>>, vector<1x1x128xf32>
    %802 = vector.shape_cast %801 : vector<1x1x128xf32> to vector<1x128xf32>
    %803 = vector.shape_cast %800 : vector<1x128xf32> to vector<1x1x128xf32>
    tpu.vector_store %arg5[%c2_387, %c0_388, %c0_389], %803 {strides = array<i32>} : memref<4x1x128xf32, #tpu.memory_space<vmem>>, vector<1x1x128xf32>,
    %804 = arith.mulf %786, %791 : vector<1x128xf32>
    %c3_390 = arith.constant 3 : index
    %c0_391 = arith.constant 0 : index
    %c0_392 = arith.constant 0 : index
    %805 = vector.load %arg5[%c3_390, %c0_391, %c0_392] : memref<4x1x128xf32, #tpu.memory_space<vmem>>, vector<1x1x128xf32>
    %806 = vector.shape_cast %805 : vector<1x1x128xf32> to vector<1x128xf32>
    %807 = vector.shape_cast %804 : vector<1x128xf32> to vector<1x1x128xf32>
    tpu.vector_store %arg5[%c3_390, %c0_391, %c0_392], %807 {strides = array<i32>} : memref<4x1x128xf32, #tpu.memory_space<vmem>>, vector<1x1x128xf32>,
    return
  }
  func.func @transform_0(%arg0: i32) -> (i32, i32, i32) {
    %c0_i32 = arith.constant 0 : i32
    %c0_i32_0 = arith.constant 0 : i32
    %c0_i32_1 = arith.constant 0 : i32
    return %c0_i32, %arg0, %c0_i32_0 : i32, i32, i32
  }
  func.func @transform_1(%arg0: i32) -> (i32, i32) {
    %c0_i32 = arith.constant 0 : i32
    %c0_i32_0 = arith.constant 0 : i32
    %c0_i32_1 = arith.constant 0 : i32
    return %c0_i32, %c0_i32_0 : i32, i32
  }
  func.func @transform_2(%arg0: i32) -> (i32, i32) {
    %c0_i32 = arith.constant 0 : i32
    %c0_i32_0 = arith.constant 0 : i32
    %c0_i32_1 = arith.constant 0 : i32
    return %c0_i32, %c0_i32_0 : i32, i32
  }
  func.func @transform_3(%arg0: i32) -> (i32, i32) {
    %c0_i32 = arith.constant 0 : i32
    %c0_i32_0 = arith.constant 0 : i32
    %c0_i32_1 = arith.constant 0 : i32
    return %c0_i32, %c0_i32_0 : i32, i32
  }
  func.func @transform_4(%arg0: i32) -> (i32, i32, i32) {
    %c0_i32 = arith.constant 0 : i32
    %c0_i32_0 = arith.constant 0 : i32
    %c0_i32_1 = arith.constant 0 : i32
    return %c0_i32, %arg0, %c0_i32_0 : i32, i32, i32
  }
}

</mosaic_0001>

<bundles_post_ra>
// kernel: anfis_forward.1
= control target key start
LH: loop header
LB: loop body
LE: loop exit
PB: predicated region body
PF: predicated region fallthrough
CT: control target
= control target key end

     0   :  { %9 = vsyncpa [#allocation4], 0  ;;  %s2031_s0 = inlined_call_operand.vmem [shape: f32[4,1,128], index: 0, kind: input, shape index: {}]   ;;  %s2032_s1 = inlined_call_operand.vmem [shape: f32[16,4], index: 1, kind: input, shape index: {}]   ;;  %s2033_s2 = inlined_call_operand.vmem [shape: f32[16,4], index: 2, kind: input, shape index: {}]   ;;  %s2034_s3 = inlined_call_operand.vmem [shape: f32[16,4], index: 3, kind: input, shape index: {}]   ;;  %s2035_s4 = inlined_call_operand.hbm [shape: f32[4,1,128], index: 4, kind: output, shape index: {}]  }
   0x1   :  { %10 = vsyncpa [#allocation6], 0 }
   0x2   :  { %11 = vsyncpa [#allocation3], 0  ;;  %s31_s17 = sshll.u32 %s2033_s2, 4  ;;  %s19_s20 = sshll.u32 %s2032_s1, 4  ;;  %s32_s17 = int_to_ptr.vmem [resolvable:$true] %s31_s17  ;;  %s20_s20 = int_to_ptr.vmem [resolvable:$true] %s19_s20 }
   0x3   :  { %s1132_s21 = scalar_lea.vmem %s32_s17, 256  ;;  %p1137_p1 = scmp.lt.s32.totalorder %s32_s17, %s32_s17 }
   0x4   :  { %p1133_p0 = scmp.ne.s32.totalorder %s32_s17, %s1132_s21  ;;  %p1138_p2 = scmp.lt.s32.totalorder %s1132_s21, %s1132_s21 }
   0x6   :  { %p1139_p3 = por %p1138_p2, %p1137_p1 }
   0x8   :  { %p1140_p4 = pnand %p1139_p3, %p1133_p0 }
   0xa   :  { %1143 = shalt.err (!%p1140_p4)
}
   0xb   :  { %s1196_s22 = smov [#allocation5]   ;;  %s1197_s23 = smov 128  }
   0xc   :  { %s1198_s24 = smov 8   ;;  %s1144_s25 = scalar_lea.vmem %s20_s20, 256 }
   0xd   :  { %37 = dma.vmem_to_smem %s32_s17, 256, %s1196_s22, [#allocation6], %s1197_s23, %s1197_s23, %s1198_s24  }
   0xe   :  { %p1145_p5 = scmp.ne.s32.totalorder %s20_s20, %s1144_s25  ;;  %p1149_p6 = scmp.lt.s32.totalorder %s20_s20, %s20_s20 }
   0xf   :  { %p1150_p7 = scmp.lt.s32.totalorder %s1144_s25, %s1144_s25 }
  0x11   :  { %p1151_p8 = por %p1150_p7, %p1149_p6 }
  0x13   :  { %p1152_p9 = pnand %p1151_p8, %p1145_p5 }
  0x15   :  { %1155 = shalt.err (!%p1152_p9)
}
  0x16   :  { %s1199_s1 = smov [#allocation2]   ;;  %s43_s27 = sshll.u32 %s2034_s3, 4  ;;  %s44_s27 = int_to_ptr.vmem [resolvable:$true] %s43_s27 }
  0x17   :  { %25 = dma.vmem_to_smem %s20_s20, 256, %s1199_s1, [#allocation4], %s1197_s23, %s1197_s23, %s1198_s24  }
  0x18   :  { %s1156_s28 = scalar_lea.vmem %s44_s27, 256  ;;  %p1161_p11 = scmp.lt.s32.totalorder %s44_s27, %s44_s27 }
  0x19   :  { %p1157_p10 = scmp.ne.s32.totalorder %s44_s27, %s1156_s28  ;;  %p1162_p12 = scmp.lt.s32.totalorder %s1156_s28, %s1156_s28 }
  0x1b   :  { %p1163_p13 = por %p1162_p12, %p1161_p11 }
  0x1d   :  { %p1164_p0 = pnand %p1163_p13, %p1157_p10 }
  0x1f   :  { %1167 = shalt.err (!%p1164_p0)
}
  0x20   :  { %s1200_s29 = smov [#allocation7]  }
  0x21   :  { %49 = dma.vmem_to_smem %s44_s27, 256, %s1200_s29, [#allocation6], %s1197_s23, %s1197_s23, %s1198_s24  }
  0x22   :  { %1190 = dma.done.wait [#allocation4], 256  }
  0x23   :  { %1191 = vsyncadd [#allocation4], 4294967040 }
  0x24   :  { %1192 = dma.done.wait [#allocation6], 512  }
  0x25   :  { %1193 = vsyncadd [#allocation6], 4294966784 }
  0x26   :  { %59 = sfence }
  0x27   :  { %s67_s30 = sld [smem:[#allocation2]]  ;;  %s897_s5 = sld [smem:[#allocation2 + $0x1]]  ;;  %v1243_v0 = vld [vmem:[%s2031_s0] sm:$0x1]  ;;  %v1250_v1 = vld [vmem:[%s2031_s0 + $0x1] sm:$0x1] }
  0x28   :  { %s899_s6 = sld [smem:[#allocation2 + $0x2]]  ;;  %s1238_s7 = sld [smem:[#allocation2 + $0x80]]  ;;  %v1259_v6 = vld [vmem:[%s2031_s0 + $0x2] sm:$0x1]  ;;  %v1281_v14 = vld [vmem:[%s2031_s0 + $0x3] sm:$0x1] }
  0x29   :  { %s908_s3 = sld [smem:[#allocation2 + $0x81]]  ;;  %s1245_s10 = sld [smem:[#allocation5]] }
  0x2a   :  { %s898_s13 = sld [smem:[#allocation5 + $0x1]]  ;;  %s901_s14 = sld [smem:[#allocation2 + $0x3]] }
  0x2b   :  { %s1252_s15 = sld [smem:[#allocation2 + $0x82]]  ;;  %s1263_s19 = sld [smem:[#allocation5 + $0x80]] }
  0x2c   :  { %s1261_s18 = sld [smem:[#allocation5 + $0x2]]  ;;  %s1266_s20 = sld [smem:[#allocation5 + $0x81]] }
  0x2d   :  { %v68_v2 = vstv %s67_s30  ;;  %v75_v3 = vstv %s897_s5  ;;  %s1268_s21 = sld [smem:[#allocation2 + $0x83]]  ;;  %s1270_s22 = sld [smem:[#allocation2 + $0x100]] }
  0x2e   :  { %v69_v4 = vsub.f32 %v1243_v0, %v68_v2  ;;  %v76_v5 = vsub.f32 %v1250_v1, %v75_v3  ;;  %v83_v7 = vstv %s899_s6  ;;  %v113_v8 = vstv %s1238_s7  ;;  %s1272_s23 = sld [smem:[#allocation2 + $0x101]]  ;;  %s1276_s24 = sld [smem:[#allocation5 + $0x3]] }
  0x2f   :  { %v120_v9 = vstv %s908_s3  ;;  %v72_v11 = vstv %s1245_s10  ;;  %v84_v13 = vsub.f32 %v1259_v6, %v83_v7  ;;  %v114_v17 = vsub.f32 %v1243_v0, %v113_v8  ;;  %s1286_s2 = sld [smem:[#allocation5 + $0x82]]  ;;  %s1291_s27 = sld [smem:[#allocation2 + $0x180]] }
  0x30   :  { %v70_v10 = vmul.f32 %v69_v4, %v69_v4  ;;  %v77_v12 = vmul.f32 %v76_v5, %v76_v5  ;;  %v79_v15 = vstv %s898_s13  ;;  %v91_v16 = vstv %s901_s14  ;;  %s1288_s26 = sld [smem:[#allocation2 + $0x102]]  ;;  %s1293_s28 = sld [smem:[#allocation2 + $0x181]] }
  0x31   :  { %v121_v18 = vsub.f32 %v1250_v1, %v120_v9  ;;  %v128_v19 = vstv %s1252_s15  ;;  %v85_v22 = vmul.f32 %v84_v13, %v84_v13  ;;  %v92_v23 = vsub.f32 %v1281_v14, %v91_v16  ;;  %s1297_s29 = sld [smem:[#allocation5 + $0x83]]  ;;  %s1302_s30 = sld [smem:[#allocation5 + $0x100]] }
  0x32   :  { %v73_v20 = vmul.f32 %v72_v11, %v70_v10  ;;  %v80_v21 = vmul.f32 %v79_v15, %v77_v12  ;;  %v87_v24 = vstv %s1261_s18  ;;  %v115_v25 = vmul.f32 %v114_v17, %v114_v17  ;;  %s1306_s5 = sld [smem:[#allocation5 + $0x101]]  ;;  %s1308_s6 = sld [smem:[#allocation2 + $0x103]] }
  0x33   :  { %v122_v26 = vmul.f32 %v121_v18, %v121_v18  ;;  %v129_v27 = vsub.f32 %v1259_v6, %v128_v19  ;;  %v117_v28 = vstv %s1263_s19  ;;  %v124_v29 = vstv %s1266_s20  ;;  %s1311_s7 = sld [smem:[#allocation2 + $0x182]]  ;;  %s1313_s3 = sld [smem:[#allocation7]] }
  0x34   :  { %v136_v30 = vstv %s1268_s21  ;;  %v163_v31 = vstv %s1270_s22  ;;  %v170_v32 = vstv %s1272_s23  ;;  %v81_v33 = vmin.f32 %v73_v20, %v80_v21  ;;  %s1316_s8 = sld [smem:[#allocation7 + $0x1]]  ;;  %s1321_s9 = sld [smem:[#allocation5 + $0x102]] }
  0x35   :  { %v88_v34 = vmul.f32 %v87_v24, %v85_v22  ;;  %v93_v35 = vmul.f32 %v92_v23, %v92_v23  ;;  %v95_v36 = vstv %s1276_s24  ;;  %v118_v37 = vmul.f32 %v117_v28, %v115_v25  ;;  %s1324_s10 = sld [smem:[#allocation5 + $0x103]]  ;;  %s1326_s11 = sld [smem:[#allocation5 + $0x180]] }
  0x36   :  { %v125_v38 = vmul.f32 %v124_v29, %v122_v26  ;;  %v130_v39 = vmul.f32 %v129_v27, %v129_v27  ;;  %v137_v40 = vsub.f32 %v1281_v14, %v136_v30  ;;  %v132_v41 = vstv %s1286_s2  ;;  %s1330_s12 = sld [smem:[#allocation5 + $0x181]]  ;;  %s1332_s13 = sld [smem:[#allocation2 + $0x183]] }
  0x37   :  { %v164_v42 = vsub.f32 %v1243_v0, %v163_v31  ;;  %v171_v43 = vsub.f32 %v1250_v1, %v170_v32  ;;  %v178_v44 = vstv %s1288_s26  ;;  %v89_v45 = vmin.f32 %v81_v33, %v88_v34  ;;  %s1335_s14 = sld [smem:[#allocation2 + $0x200]]  ;;  %s1337_s15 = sld [smem:[#allocation2 + $0x201]] }
  0x38   :  { %v96_v46 = vmul.f32 %v95_v36, %v93_v35  ;;  %v213_v47 = vstv %s1291_s27  ;;  %v220_v48 = vstv %s1293_s28  ;;  %v126_v49 = vmin.f32 %v118_v37, %v125_v38  ;;  %s1341_s16 = sld [smem:[#allocation7 + $0x2]]  ;;  %s1347_s17 = sld [smem:[#allocation7 + $0x3]] }
  0x39   :  { %v133_v50 = vmul.f32 %v132_v41, %v130_v39  ;;  %v138_v51 = vmul.f32 %v137_v40, %v137_v40  ;;  %v140_v52 = vstv %s1297_s29  ;;  %v165_v53 = vmul.f32 %v164_v42, %v164_v42  ;;  %s1350_s18 = sld [smem:[#allocation5 + $0x182]]  ;;  %s1353_s19 = sld [smem:[#allocation7 + $0x80]] }
  0x3a   :  { %v167_v54 = vstv %s1302_s30  ;;  %v172_v55 = vmul.f32 %v171_v43, %v171_v43  ;;  %v179_v56 = vsub.f32 %v1259_v6, %v178_v44  ;;  %v174_v57 = vstv %s1306_s5  ;;  %s1355_s20 = sld [smem:[#allocation2 + $0x202]]  ;;  %s1358_s21 = sld [smem:[#allocation2 + $0x280]] }
  0x3b   :  { %v186_v58 = vstv %s1308_s6  ;;  %v214_v59 = vsub.f32 %v1243_v0, %v213_v47  ;;  %v221_v60 = vsub.f32 %v1250_v1, %v220_v48  ;;  %v228_v61 = vstv %s1311_s7  ;;  %s1362_s22 = sld [smem:[#allocation2 + $0x281]]  ;;  %s1368_s23 = sld [smem:[#allocation5 + $0x183]] }
  0x3c   :  { %v97_v62 = vmin.f32 %v89_v45, %v96_v46  ;;  %v101_v63 = vstv %s1313_s3  ;;  %v134_v2 = vmin.f32 %v126_v49, %v133_v50  ;;  %v141_v3 = vmul.f32 %v140_v52, %v138_v51  ;;  %s1370_s24 = sld [smem:[#allocation5 + $0x200]]  ;;  %s1375_s25 = sld [smem:[#allocation5 + $0x201]] }
  0x3d   :  { %v168_v4 = vmul.f32 %v167_v54, %v165_v53  ;;  %v175_v5 = vmul.f32 %v174_v57, %v172_v55  ;;  %v180_v7 = vmul.f32 %v179_v56, %v179_v56  ;;  %v187_v8 = vsub.f32 %v1281_v14, %v186_v58  ;;  %s1377_s1 = sld [smem:[#allocation2 + $0x203]]  ;;  %s1379_s2 = sld [smem:[#allocation7 + $0x81]] }
  0x3e   :  { %v182_v9 = vstv %s1321_s9  ;;  %v215_v10 = vmul.f32 %v214_v59, %v214_v59  ;;  %v222_v11 = vmul.f32 %v221_v60, %v221_v60  ;;  %v229_v12 = vsub.f32 %v1259_v6, %v228_v61  ;;  %s1381_s26 = sld [smem:[#allocation7 + $0x82]]  ;;  %s1387_s28 = sld [smem:[#allocation7 + $0x83]] }
  0x3f   :  { %v104_v13 = vstv %s1316_s8  ;;  %v217_v15 = vstv %s1326_s11  ;;  %v224_v16 = vstv %s1330_s12  ;;  %v236_v17 = vstv %s1332_s13  ;;  %s1384_s27 = sld [smem:[#allocation2 + $0x282]]  ;;  %s1389_s29 = sld [smem:[#allocation7 + $0x100]] }
  0x40   :  { %v98_v18 = vmul.f32 1.442695, %v97_v62  ;;  %v190_v19 = vstv %s1324_s10  ;;  %v263_v20 = vstv %s1335_s14  ;;  %v270_v21 = vstv %s1337_s15  ;;  %s1396_s30 = sld [smem:[#allocation7 + $0x101]]  ;;  %s1399_s5 = sld [smem:[#allocation5 + $0x202]] }
  0x41   :  { %v142_v22 = vmin.f32 %v134_v2, %v141_v3  ;;  %v176_v23 = vmin.f32 %v168_v4, %v175_v5  ;;  %v183_v24 = vmul.f32 %v182_v9, %v180_v7  ;;  %v188_v25 = vmul.f32 %v187_v8, %v187_v8  ;;  %s1402_s6 = sld [smem:[#allocation5 + $0x280]]  ;;  %s1404_s7 = sld [smem:[#allocation2 + $0x283]] }
  0x42   :  { %v218_v26 = vmul.f32 %v217_v15, %v215_v10  ;;  %v225_v27 = vmul.f32 %v224_v16, %v222_v11  ;;  %v230_v28 = vmul.f32 %v229_v12, %v229_v12  ;;  %v237_v29 = vsub.f32 %v1281_v14, %v236_v17  ;;  %s1406_s9 = sld [smem:[#allocation7 + $0x102]]  ;;  %s1409_s10 = sld [smem:[#allocation5 + $0x281]] }
  0x43   :  { %v107_v30 = vstv %s1341_s16  ;;  %v232_v31 = vstv %s1350_s18  ;;  %v264_v32 = vsub.f32 %v1243_v0, %v263_v20  ;;  %v271_v33 = vsub.f32 %v1250_v1, %v270_v21  ;;  %s1411_s11 = sld [smem:[#allocation7 + $0x103]]  ;;  %s1415_s12 = sld [smem:[#allocation7 + $0x180]] }
  0x44   :  { %1094 = vpow2.f32 %v98_v18  ;;  %v110_v34 = vstv %s1347_s17  ;;  %v147_v35 = vstv %s1353_s19  ;;  %v278_v36 = vstv %s1355_s20  ;;  %s1420_s13 = sld [smem:[#allocation5 + $0x203]]  ;;  %s1426_s14 = sld [smem:[#allocation2 + $0x300]] }
  0x45   :  { %v143_v37 = vmul.f32 1.442695, %v142_v22  ;;  %v184_v38 = vmin.f32 %v176_v23, %v183_v24  ;;  %v191_v39 = vmul.f32 %v190_v19, %v188_v25  ;;  %v313_v40 = vstv %s1358_s21  ;;  %s1428_s15 = sld [smem:[#allocation2 + $0x301]]  ;;  %s1433_s20 = sld [smem:[#allocation5 + $0x282]] }
  0x46   :  { %v226_v41 = vmin.f32 %v218_v26, %v225_v27  ;;  %v233_v42 = vmul.f32 %v232_v31, %v230_v28  ;;  %v238_v43 = vmul.f32 %v237_v29, %v237_v29  ;;  %v320_v44 = vstv %s1362_s22  ;;  %s1430_s18 = sld [smem:[#allocation7 + $0x181]]  ;;  %s1442_s21 = sld [smem:[#allocation5 + $0x283]] }
  0x47   :  { %v240_v45 = vstv %s1368_s23  ;;  %v265_v46 = vmul.f32 %v264_v32, %v264_v32  ;;  %v272_v47 = vmul.f32 %v271_v33, %v271_v33  ;;  %v279_v48 = vsub.f32 %v1259_v6, %v278_v36  ;;  %s1444_s22 = sld [smem:[#allocation2 + $0x302]]  ;;  %s1492_s8 = sld [smem:[#allocation7 + $0x200]] }
  0x48   :  { %v267_v49 = vstv %s1370_s24  ;;  %v274_v50 = vstv %s1375_s25  ;;  %v286_v51 = vstv %s1377_s1  ;;  %v314_v52 = vsub.f32 %v1243_v0, %v313_v40  ;;  %s1448_s23 = sld [smem:[#allocation7 + $0x182]]  ;;  %s1454_s24 = sld [smem:[#allocation5 + $0x300]] }
  0x49   :  { %1096 = vpow2.f32 %v143_v37  ;;  %v151_v53 = vstv %s1379_s2  ;;  %v155_v54 = vstv %s1381_s26  ;;  %v321_v55 = vsub.f32 %v1250_v1, %v320_v44  ;;  %s1458_s25 = sld [smem:[#allocation5 + $0x301]]  ;;  %s1460_s1 = sld [smem:[#allocation2 + $0x303]] }
  0x4a   :  { %v192_v56 = vmin.f32 %v184_v38, %v191_v39  ;;  %v234_v57 = vmin.f32 %v226_v41, %v233_v42  ;;  %v241_v58 = vmul.f32 %v240_v45, %v238_v43  ;;  %v328_v59 = vstv %s1384_s27  ;;  %s1464_s27 = sld [smem:[#allocation7 + $0x183]]  ;;  %s1479_s3 = sld [smem:[#allocation5 + $0x302]] }
  0x4b   :  { %v268_v60 = vmul.f32 %v267_v49, %v265_v46  ;;  %v275_v61 = vmul.f32 %v274_v50, %v272_v47  ;;  %v280_v62 = vmul.f32 %v279_v48, %v279_v48  ;;  %v287_v2 = vsub.f32 %v1281_v14, %v286_v51  ;;  %s1494_s16 = sld [smem:[#allocation2 + $0x382]]  ;;  %s1500_s17 = sld [smem:[#allocation5 + $0x303]] }
  0x4c   :  { %v159_v3 = vstv %s1387_s28  ;;  %v197_v4 = vstv %s1389_s29  ;;  %v282_v5 = vstv %s1399_s5  ;;  %v315_v7 = vmul.f32 %v314_v52, %v314_v52  ;;  %s1469_s5 = sld [smem:[#allocation2 + $0x380]]  ;;  %s1509_s2 = sld [smem:[#allocation5 + $0x381]] }
  0x4d   :  { %v317_v8 = vstv %s1402_s6  ;;  %v322_v9 = vmul.f32 %v321_v55, %v321_v55  ;;  %v329_v10 = vsub.f32 %v1259_v6, %v328_v59  ;;  %v336_v11 = vstv %s1404_s7  ;;  %s1471_s6 = sld [smem:[#allocation2 + $0x381]]  ;;  %s1505_s19 = sld [smem:[#allocation5 + $0x380]] }
  0x4e   :  { %v1095_v12 = vpop.eup %1094  ;;  %v193_v15 = vmul.f32 1.442695, %v192_v56  ;;  %v201_v16 = vstv %s1396_s30  ;;  %v205_v17 = vstv %s1406_s9  ;;  %v324_v18 = vstv %s1409_s10  ;;  %s1511_s26 = sld [smem:[#allocation2 + $0x383]]  ;;  %s1519_s28 = sld [smem:[#allocation7 + $0x201]] }
  0x4f   :  { %v242_v19 = vmin.f32 %v234_v57, %v241_v58  ;;  %v276_v20 = vmin.f32 %v268_v60, %v275_v61  ;;  %v283_v21 = vmul.f32 %v282_v5, %v280_v62  ;;  %v288_v22 = vmul.f32 %v287_v2, %v287_v2  ;;  %s1521_s7 = sld [smem:[#allocation7 + $0x202]]  ;;  %s1528_s29 = sld [smem:[#allocation7 + $0x203]] }
  0x50   :  { %v209_v23 = vstv %s1411_s11  ;;  %v290_v24 = vstv %s1420_s13  ;;  %v318_v25 = vmul.f32 %v317_v8, %v315_v7  ;;  %v337_v26 = vsub.f32 %v1281_v14, %v336_v11  ;;  %s1531_s10 = sld [smem:[#allocation5 + $0x382]]  ;;  %s1535_s30 = sld [smem:[#allocation7 + $0x280]] }
  0x51   :  { %v325_v27 = vmul.f32 %v324_v18, %v322_v9  ;;  %v330_v28 = vmul.f32 %v329_v10, %v329_v10  ;;  %v363_v29 = vstv %s1426_s14  ;;  %v370_v31 = vstv %s1428_s15  ;;  %s1537_s9 = sld [smem:[#allocation7 + $0x281]]  ;;  %s1540_s13 = sld [smem:[#allocation7 + $0x282]] }
  0x52   :  { %1098 = vpow2.f32 %v193_v15  ;;  %v247_v32 = vstv %s1415_s12  ;;  %v251_v33 = vstv %s1430_s18  ;;  %v332_v36 = vstv %s1433_s20  ;;  %s1543_s11 = sld [smem:[#allocation5 + $0x383]]  ;;  %s1548_s14 = sld [smem:[#allocation2 + $0x400]] }
  0x53   :  { %v1097_v37 = vpop.eup %1096  ;;  %v102_v38 = vmul.f32 %v1095_v12, %v101_v63  ;;  %v243_v39 = vmul.f32 1.442695, %v242_v19  ;;  %v284_v40 = vmin.f32 %v276_v20, %v283_v21  ;;  %v291_v41 = vmul.f32 %v290_v24, %v288_v22  ;;  %s1550_s15 = sld [smem:[#allocation2 + $0x401]]  ;;  %s1554_s20 = sld [smem:[#allocation7 + $0x283]] }
  0x54   :  { %v105_v42 = vmul.f32 %v1095_v12, %v104_v13  ;;  %v338_v43 = vmul.f32 %v337_v26, %v337_v26  ;;  %v364_v44 = vsub.f32 %v1243_v0, %v363_v29  ;;  %v371_v45 = vsub.f32 %v1250_v1, %v370_v31  ;;  %s1564_s12 = sld [smem:[#allocation7 + $0x302]]  ;;  %s1570_s18 = sld [smem:[#allocation7 + $0x303]] }
  0x55   :  { %v326_v63 = vmin.f32 %v318_v25, %v325_v27  ;;  %v333_v46 = vmul.f32 %v332_v36, %v330_v28  ;;  %v340_v47 = vstv %s1442_s21  ;;  %v378_v48 = vstv %s1444_s22  ;;  %s1556_s21 = sld [smem:[#allocation7 + $0x300]]  ;;  %s1562_s22 = sld [smem:[#allocation7 + $0x301]] }
  0x56   :  { %v108_v49 = vmul.f32 %v1095_v12, %v107_v30  ;;  %v111_v50 = vmul.f32 %v1095_v12, %v110_v34  ;;  %v148_v13 = vmul.f32 %v1097_v37, %v147_v35  ;;  %v255_v51 = vstv %s1448_s23  ;;  %s1574_s23 = sld [smem:[#allocation7 + $0x380]] }
  0x57   :  { %v152_v52 = vmul.f32 %v1097_v37, %v151_v53  ;;  %v156_v55 = vmul.f32 %v1097_v37, %v155_v54  ;;  %1100 = vpow2.f32 %v243_v39  ;;  %v292_v56 = vmin.f32 %v284_v40, %v291_v41 }
  0x58   :  { %v341_v30 = vmul.f32 %v340_v47, %v338_v43  ;;  %v365_v57 = vmul.f32 %v364_v44, %v364_v44  ;;  %v372_v34 = vmul.f32 %v371_v45, %v371_v45  ;;  %v379_v35 = vsub.f32 %v1259_v6, %v378_v48 }
  0x59   :  { %v334_v58 = vmin.f32 %v326_v63, %v333_v46  ;;  %v367_v59 = vstv %s1454_s24  ;;  %v374_v53 = vstv %s1458_s25  ;;  %v386_v60 = vstv %s1460_s1  ;;  %s1577_s24 = sld [smem:[#allocation7 + $0x381]]  ;;  %s1579_s25 = sld [smem:[#allocation7 + $0x382]] }
  0x5a   :  { %v145_v54 = vadd.f32 %v1097_v37, %v1095_v12  ;;  %v149_v61 = vadd.f32 %v148_v13, %v102_v38  ;;  %v160_v62 = vmul.f32 %v1097_v37, %v159_v3  ;;  %v259_v2 = vstv %s1464_s27  ;;  %s1581_s1 = sld [smem:[#allocation7 + $0x383]]  ;;  %s1583_s27 = sld [smem:[#allocation5 + $0x400]] }
  0x5b   :  { %v153_v5 = vadd.f32 %v152_v52, %v105_v42  ;;  %v293_v7 = vmul.f32 1.442695, %v292_v56  ;;  %v413_v8 = vstv %s1469_s5  ;;  %v420_v9 = vstv %s1471_s6  ;;  %s1588_s5 = sld [smem:[#allocation5 + $0x401]]  ;;  %s1590_s6 = sld [smem:[#allocation2 + $0x402]] }
  0x5c   :  { %v1099_v10 = vpop.eup %1098  ;;  %v368_v11 = vmul.f32 %v367_v59, %v365_v57  ;;  %v375_v12 = vmul.f32 %v374_v53, %v372_v34  ;;  %v380_v15 = vmul.f32 %v379_v35, %v379_v35  ;;  %v387_v3 = vsub.f32 %v1281_v14, %v386_v60 }
  0x5d   :  { %v157_v18 = vadd.f32 %v156_v55, %v108_v49  ;;  %v198_v19 = vmul.f32 %v1099_v10, %v197_v4  ;;  %v342_v20 = vmin.f32 %v334_v58, %v341_v30  ;;  %v382_v21 = vstv %s1479_s3  ;;  %s1593_s3 = sld [smem:[#allocation2 + $0x480]] }
  0x5e   :  { %v161_v22 = vadd.f32 %v160_v62, %v111_v50  ;;  %v202_v24 = vmul.f32 %v1099_v10, %v201_v16  ;;  %v414_v25 = vsub.f32 %v1243_v0, %v413_v8  ;;  %v421_v26 = vsub.f32 %v1250_v1, %v420_v9 }
  0x5f   :  { %v206_v27 = vmul.f32 %v1099_v10, %v205_v17  ;;  %1102 = vpow2.f32 %v293_v7  ;;  %v297_v28 = vstv %s1492_s8  ;;  %v428_v4 = vstv %s1494_s16  ;;  %s1595_s8 = sld [smem:[#allocation2 + $0x481]]  ;;  %s1601_s16 = sld [smem:[#allocation2 + $0x403]] }
  0x60   :  { %v210_v16 = vmul.f32 %v1099_v10, %v209_v23  ;;  %v376_v29 = vmin.f32 %v368_v11, %v375_v12  ;;  %v383_v31 = vmul.f32 %v382_v21, %v380_v15  ;;  %v388_v36 = vmul.f32 %v387_v3, %v387_v3 }
  0x61   :  { %v1101_v37 = vpop.eup %1100  ;;  %v195_v17 = vadd.f32 %v1099_v10, %v145_v54  ;;  %v199_v38 = vadd.f32 %v198_v19, %v149_v61  ;;  %v343_v39 = vmul.f32 1.442695, %v342_v20  ;;  %v390_v40 = vstv %s1500_s17  ;;  %s1605_s17 = sld [smem:[#allocation5 + $0x402]] }
  0x62   :  { %v203_v41 = vadd.f32 %v202_v24, %v153_v5  ;;  %v415_v23 = vmul.f32 %v414_v25, %v414_v25  ;;  %v422_v42 = vmul.f32 %v421_v26, %v421_v26  ;;  %v429_v43 = vsub.f32 %v1259_v6, %v428_v4 }
  0x63   :  { %v207_v44 = vadd.f32 %v206_v27, %v157_v18  ;;  %v417_v45 = vstv %s1505_s19  ;;  %v424_v63 = vstv %s1509_s2  ;;  %v436_v46 = vstv %s1511_s26  ;;  %s1607_s19 = sld [smem:[#allocation5 + $0x403]]  ;;  %s1610_s2 = sld [smem:[#allocation7 + $0x400]] }
  0x64   :  { %v211_v47 = vadd.f32 %v210_v16, %v161_v22  ;;  %v248_v48 = vmul.f32 %v1101_v37, %v247_v32  ;;  %v384_v49 = vmin.f32 %v376_v29, %v383_v31  ;;  %v391_v50 = vmul.f32 %v390_v40, %v388_v36  ;;  %s1612_s26 = sld [smem:[#allocation7 + $0x401]] }
  0x65   :  { %v252_v13 = vmul.f32 %v1101_v37, %v251_v33  ;;  %v256_v52 = vmul.f32 %v1101_v37, %v255_v51  ;;  %v260_v55 = vmul.f32 %v1101_v37, %v259_v2  ;;  %1104 = vpow2.f32 %v343_v39 }
  0x66   :  { %v418_v32 = vmul.f32 %v417_v45, %v415_v23  ;;  %v425_v56 = vmul.f32 %v424_v63, %v422_v42  ;;  %v430_v30 = vmul.f32 %v429_v43, %v429_v43  ;;  %v437_v57 = vsub.f32 %v1281_v14, %v436_v46 }
  0x67   :  { %v301_v34 = vstv %s1519_s28  ;;  %v305_v35 = vstv %s1521_s7  ;;  %v309_v58 = vstv %s1528_s29  ;;  %v432_v33 = vstv %s1531_s10  ;;  %s1615_s28 = sld [smem:[#allocation7 + $0x402]]  ;;  %s1620_s29 = sld [smem:[#allocation2 + $0x500]] }
  0x68   :  { %v245_v51 = vadd.f32 %v1101_v37, %v195_v17  ;;  %v249_v59 = vadd.f32 %v248_v48, %v199_v38  ;;  %v347_v53 = vstv %s1535_s30  ;;  %v392_v60 = vmin.f32 %v384_v49, %v391_v50  ;;  %s1617_s7 = sld [smem:[#allocation2 + $0x482]]  ;;  %s1622_s10 = sld [smem:[#allocation2 + $0x501]] }
  0x69   :  { %v1103_v54 = vpop.eup %1102  ;;  %v253_v61 = vadd.f32 %v252_v13, %v203_v41  ;;  %v257_v62 = vadd.f32 %v256_v52, %v207_v44  ;;  %v261_v2 = vadd.f32 %v260_v55, %v211_v47  ;;  %v351_v5 = vstv %s1537_s9  ;;  %s1625_s30 = sld [smem:[#allocation7 + $0x403]] }
  0x6a   :  { %v298_v7 = vmul.f32 %v1103_v54, %v297_v28  ;;  %v426_v8 = vmin.f32 %v418_v32, %v425_v56  ;;  %v433_v9 = vmul.f32 %v432_v33, %v430_v30  ;;  %v438_v10 = vmul.f32 %v437_v57, %v437_v57  ;;  %s1630_s9 = sld [smem:[#allocation2 + $0x483]] }
  0x6b   :  { %v302_v11 = vmul.f32 %v1103_v54, %v301_v34  ;;  %v440_v12 = vstv %s1543_s11  ;;  %v463_v15 = vstv %s1548_s14  ;;  %v470_v3 = vstv %s1550_s15  ;;  %s1637_s11 = sld [smem:[#allocation5 + $0x481]]  ;;  %s1646_s14 = sld [smem:[#allocation2 + $0x502]] }
  0x6c   :  { %v306_v18 = vmul.f32 %v1103_v54, %v305_v35  ;;  %v310_v19 = vmul.f32 %v1103_v54, %v309_v58  ;;  %v355_v20 = vstv %s1540_s13  ;;  %v393_v21 = vmul.f32 1.442695, %v392_v60  ;;  %s1634_s13 = sld [smem:[#allocation5 + $0x480]]  ;;  %s1660_s15 = sld [smem:[#allocation5 + $0x482]] }
  0x6d   :  { %v359_v22 = vstv %s1554_s20  ;;  %v397_v24 = vstv %s1556_s21  ;;  %v401_v25 = vstv %s1562_s22  ;;  %v405_v26 = vstv %s1564_s12  ;;  %s1662_s20 = sld [smem:[#allocation5 + $0x500]]  ;;  %s1708_s22 = sld [smem:[#allocation2 + $0x601]] }
  0x6e   :  { %v434_v27 = vmin.f32 %v426_v8, %v433_v9  ;;  %v441_v28 = vmul.f32 %v440_v12, %v438_v10  ;;  %v464_v4 = vsub.f32 %v1243_v0, %v463_v15  ;;  %v471_v16 = vsub.f32 %v1250_v1, %v470_v3  ;;  %s1706_s21 = sld [smem:[#allocation2 + $0x600]]  ;;  %s1712_s12 = sld [smem:[#allocation5 + $0x503]] }
  0x6f   :  { %v1105_v29 = vpop.eup %1104  ;;  %v295_v31 = vadd.f32 %v1103_v54, %v245_v51  ;;  %v299_v36 = vadd.f32 %v298_v7, %v249_v59  ;;  %v303_v37 = vadd.f32 %v302_v11, %v253_v61  ;;  %v409_v17 = vstv %s1570_s18  ;;  %s1717_s18 = sld [smem:[#allocation5 + $0x580]] }
  0x70   :  { %v307_v38 = vadd.f32 %v306_v18, %v257_v62  ;;  %v311_v39 = vadd.f32 %v310_v19, %v261_v2  ;;  %1106 = vpow2.f32 %v393_v21  ;;  %v447_v40 = vstv %s1574_s23  ;;  %s1869_s23 = sld [smem:[#allocation2 + $0x780]] }
  0x71   :  { %v348_v41 = vmul.f32 %v1105_v29, %v347_v53  ;;  %v352_v23 = vmul.f32 %v1105_v29, %v351_v5  ;;  %v356_v42 = vmul.f32 %v1105_v29, %v355_v20  ;;  %v451_v43 = vstv %s1577_s24  ;;  %s1875_s24 = sld [smem:[#allocation7 + $0x500]] }
  0x72   :  { %v442_v44 = vmin.f32 %v434_v27, %v441_v28  ;;  %v455_v45 = vstv %s1579_s25  ;;  %v465_v63 = vmul.f32 %v464_v4, %v464_v4  ;;  %v472_v46 = vmul.f32 %v471_v16, %v471_v16  ;;  %s1885_s25 = sld [smem:[#allocation2 + $0x781]] }
  0x73   :  { %v360_v47 = vmul.f32 %v1105_v29, %v359_v22  ;;  %v467_v48 = vstv %s1583_s27  ;;  %v474_v49 = vstv %s1588_s5  ;;  %v478_v50 = vstv %s1590_s6  ;;  %s1668_s27 = sld [smem:[#allocation5 + $0x501]]  ;;  %s1670_s5 = sld [smem:[#allocation2 + $0x503]] }
  0x74   :  { %v345_v13 = vadd.f32 %v1105_v29, %v295_v31  ;;  %v459_v52 = vstv %s1581_s1  ;;  %v513_v55 = vstv %s1593_s3  ;;  %v520_v32 = vstv %s1595_s8  ;;  %s1674_s6 = sld [smem:[#allocation2 + $0x580]]  ;;  %s1676_s3 = sld [smem:[#allocation2 + $0x581]] }
  0x75   :  { %v1639_v56 = vadd.f32 %v348_v41, %v299_v36  ;;  %v1641_v30 = vadd.f32 %v352_v23, %v303_v37  ;;  %v1643_v57 = vadd.f32 %v356_v42, %v307_v38  ;;  %v486_v34 = vstv %s1601_s16  ;;  %s1680_s8 = sld [smem:[#allocation5 + $0x483]]  ;;  %s1691_s16 = sld [smem:[#allocation5 + $0x502]] }
  0x76   :  { %v443_v35 = vmul.f32 1.442695, %v442_v44  ;;  %v1648_v58 = vmul.f32 %v467_v48, %v465_v63  ;;  %v475_v33 = vmul.f32 %v474_v49, %v472_v46  ;;  %v479_v51 = vsub.f32 %v1259_v6, %v478_v50  ;;  %s1903_s1 = sld [smem:[#allocation5 + $0x782]] }
  0x77   :  { %v1651_v59 = vadd.f32 %v360_v47, %v311_v39  ;;  %v482_v53 = vstv %s1605_s17  ;;  %v514_v60 = vsub.f32 %v1243_v0, %v513_v55  ;;  %v521_v54 = vsub.f32 %v1250_v1, %v520_v32  ;;  %s1698_s17 = sld [smem:[#allocation2 + $0x582]] }
  0x78   :  { %v487_v61 = vsub.f32 %v1281_v14, %v486_v34  ;;  %v490_v62 = vstv %s1607_s19  ;;  %v497_v2 = vstv %s1610_s2  ;;  %v528_v5 = vstv %s1617_s7  ;;  %s1700_s19 = sld [smem:[#allocation2 + $0x583]]  ;;  %s1721_s7 = sld [smem:[#allocation5 + $0x581]] }
  0x79   :  { %v501_v7 = vstv %s1612_s26  ;;  %v505_v8 = vstv %s1615_s28  ;;  %v563_v9 = vstv %s1620_s29  ;;  %v570_v10 = vstv %s1622_s10  ;;  %s1727_s29 = sld [smem:[#allocation7 + $0x480]]  ;;  %s1729_s10 = sld [smem:[#allocation7 + $0x481]] }
  0x7a   :  { %v1107_v11 = vpop.eup %1106  ;;  %1108 = vpow2.f32 %v443_v35  ;;  %v476_v12 = vmin.f32 %v1648_v58, %v475_v33  ;;  %v480_v15 = vmul.f32 %v479_v51, %v479_v51  ;;  %v509_v3 = vstv %s1625_s30  ;;  %s1931_s2 = sld [smem:[#allocation7 + $0x503]]  ;;  %s1941_s26 = sld [smem:[#allocation7 + $0x580]] }
  0x7b   :  { %v515_v18 = vmul.f32 %v514_v60, %v514_v60  ;;  %v522_v19 = vmul.f32 %v521_v54, %v521_v54  ;;  %v529_v20 = vsub.f32 %v1259_v6, %v528_v5  ;;  %v536_v21 = vstv %s1630_s9  ;;  %s1733_s9 = sld [smem:[#allocation7 + $0x482]]  ;;  %s1943_s28 = sld [smem:[#allocation7 + $0x581]] }
  0x7c   :  { %v517_v22 = vstv %s1634_s13  ;;  %v524_v27 = vstv %s1637_s11  ;;  %v564_v28 = vsub.f32 %v1243_v0, %v563_v9  ;;  %v571_v4 = vsub.f32 %v1250_v1, %v570_v10  ;;  %s1736_s13 = sld [smem:[#allocation2 + $0x602]]  ;;  %s1952_s30 = sld [smem:[#allocation7 + $0x583]] }
  0x7d   :  { %v1686_v16 = vadd.f32 %v1107_v11, %v345_v13  ;;  %v398_v29 = vmul.f32 %v1107_v11, %v397_v24  ;;  %v488_v31 = vmul.f32 %v487_v61, %v487_v61  ;;  %v578_v36 = vstv %s1646_s14  ;;  %s1748_s11 = sld [smem:[#allocation5 + $0x582]]  ;;  %s1750_s14 = sld [smem:[#allocation5 + $0x600]] }
  0x7e   :  { %v402_v37 = vmul.f32 %v1107_v11, %v401_v25  ;;  %v406_v38 = vmul.f32 %v1107_v11, %v405_v26  ;;  %v483_v39 = vmul.f32 %v482_v53, %v480_v15  ;;  %v537_v41 = vsub.f32 %v1281_v14, %v536_v21 }
  0x7f   :  { %v1704_v24 = vmul.f32 %v1107_v11, %v409_v17  ;;  %v518_v23 = vmul.f32 %v517_v22, %v515_v18  ;;  %v525_v42 = vmul.f32 %v524_v27, %v522_v19  ;;  %v530_v44 = vmul.f32 %v529_v20, %v529_v20 }
  0x80   :  { %v532_v25 = vstv %s1660_s15  ;;  %v565_v26 = vmul.f32 %v564_v28, %v564_v28  ;;  %v572_v63 = vmul.f32 %v571_v4, %v571_v4  ;;  %v579_v46 = vsub.f32 %v1259_v6, %v578_v36  ;;  %s1755_s15 = sld [smem:[#allocation5 + $0x601]]  ;;  %v1773_v36 = vld [vmem:[%s2031_s0] sm:$0x1] }
  0x81   :  { %v491_v47 = vmul.f32 %v490_v62, %v488_v31  ;;  %v567_v17 = vstv %s1662_s20  ;;  %v574_v48 = vstv %s1668_s27  ;;  %v586_v49 = vstv %s1670_s5  ;;  %s1757_s20 = sld [smem:[#allocation2 + $0x603]] }
  0x82   :  { %v484_v50 = vmin.f32 %v476_v12, %v483_v39  ;;  %v538_v13 = vmul.f32 %v537_v41, %v537_v41  ;;  %v613_v55 = vstv %s1674_s6  ;;  %v620_v32 = vstv %s1676_s3  ;;  %s1759_s27 = sld [smem:[#allocation7 + $0x483]]  ;;  %s1766_s6 = sld [smem:[#allocation2 + $0x680]] }
  0x83   :  { %v1724_v34 = vadd.f32 %v398_v29, %v1639_v56  ;;  %v526_v35 = vmin.f32 %v518_v23, %v525_v42  ;;  %v533_v58 = vmul.f32 %v532_v25, %v530_v44  ;;  %v540_v33 = vstv %s1680_s8  ;;  %s1762_s5 = sld [smem:[#allocation5 + $0x583]]  ;;  %s1812_s8 = sld [smem:[#allocation5 + $0x682]] }
  0x84   :  { %v1731_v51 = vpop.eup %1108  ;;  %v568_v53 = vmul.f32 %v567_v17, %v565_v26  ;;  %v575_v60 = vmul.f32 %v574_v48, %v572_v63  ;;  %v580_v54 = vmul.f32 %v579_v46, %v579_v46  ;;  %v587_v56 = vsub.f32 %v1281_v14, %v586_v49  ;;  %s1905_s3 = sld [smem:[#allocation5 + $0x783]] }
  0x85   :  { %v1739_v61 = vadd.f32 %v402_v37, %v1641_v30  ;;  %v582_v62 = vstv %s1691_s16  ;;  %v614_v5 = vsub.f32 %v1243_v0, %v613_v55  ;;  %v621_v9 = vsub.f32 %v1250_v1, %v620_v32  ;;  %v1808_v55 = vld [vmem:[%s2031_s0 + $0x2] sm:$0x1]  ;;  %s1842_s16 = sld [smem:[#allocation5 + $0x701]] }
  0x86   :  { %v1745_v10 = vadd.f32 %v406_v38, %v1643_v57  ;;  %v492_v11 = vmin.f32 %v484_v50, %v491_v47  ;;  %v541_v12 = vmul.f32 %v540_v33, %v538_v13  ;;  %v628_v15 = vstv %s1698_s17  ;;  %v1779_v38 = vld [vmem:[%s2031_s0 + $0x1] sm:$0x1]  ;;  %s1845_s17 = sld [smem:[#allocation2 + $0x702]] }
  0x87   :  { %v534_v18 = vmin.f32 %v526_v35, %v533_v58  ;;  %v636_v30 = vstv %s1700_s19  ;;  %v663_v19 = vstv %s1706_s21  ;;  %v670_v20 = vstv %s1708_s22  ;;  %s1788_s19 = sld [smem:[#allocation5 + $0x602]]  ;;  %s1790_s21 = sld [smem:[#allocation2 + $0x681]] }
  0x88   :  { %v576_v0 = vmin.f32 %v568_v53, %v575_v60  ;;  %v583_v1 = vmul.f32 %v582_v62, %v580_v54  ;;  %v588_v57 = vmul.f32 %v587_v56, %v587_v56  ;;  %v590_v21 = vstv %s1712_s12  ;;  %s1794_s22 = sld [smem:[#allocation5 + $0x680]]  ;;  %s1796_s12 = sld [smem:[#allocation2 + $0x682]] }
  0x89   :  { %v615_v22 = vmul.f32 %v614_v5, %v614_v5  ;;  %v617_v27 = vstv %s1717_s18  ;;  %v622_v28 = vmul.f32 %v621_v9, %v621_v9  ;;  %v629_v4 = vsub.f32 %v1259_v6, %v628_v15  ;;  %s1798_s18 = sld [smem:[#allocation5 + $0x681]] }
  0x8a   :  { %v624_v29 = vstv %s1721_s7  ;;  %v637_v31 = vsub.f32 %v1281_v14, %v636_v30  ;;  %v664_v37 = vsub.f32 %v1773_v36, %v663_v19  ;;  %v671_v6 = vsub.f32 %v1779_v38, %v670_v20  ;;  %s1800_s7 = sld [smem:[#allocation2 + $0x683]] }
  0x8b   :  { %v1784_v39 = vadd.f32 %v1704_v24, %v1651_v59  ;;  %v493_v41 = vmul.f32 1.442695, %v492_v11  ;;  %v547_v14 = vstv %s1727_s29  ;;  %v551_v23 = vstv %s1729_s10  ;;  %v1824_v11 = vld [vmem:[%s2031_s0 + $0x3] sm:$0x1]  ;;  %s1837_s0 = sld [smem:[#allocation2 + $0x701]]  ;;  %s1966_s10 = sld [smem:[#allocation7 + $0x602]] }
  0x8c   :  { %v542_v42 = vmin.f32 %v534_v18, %v541_v12  ;;  %v555_v44 = vstv %s1733_s9  ;;  %v584_v25 = vmin.f32 %v576_v0, %v583_v1  ;;  %v678_v26 = vstv %s1736_s13  ;;  %s1898_s13 = sld [smem:[#allocation2 + $0x783]]  ;;  %s1964_s29 = sld [smem:[#allocation7 + $0x601]] }
  0x8d   :  { %v591_v59 = vmul.f32 %v590_v21, %v588_v57  ;;  %v618_v24 = vmul.f32 %v617_v27, %v615_v22  ;;  %v625_v63 = vmul.f32 %v624_v29, %v622_v28  ;;  %v630_v46 = vmul.f32 %v629_v4, %v629_v4  ;;  %s1970_s9 = sld [smem:[#allocation7 + $0x603]] }
  0x8e   :  { %v632_v47 = vstv %s1748_s11  ;;  %v638_v17 = vmul.f32 %v637_v31, %v637_v31  ;;  %v665_v48 = vmul.f32 %v664_v37, %v664_v37  ;;  %v672_v49 = vmul.f32 %v671_v6, %v671_v6  ;;  %s1816_s11 = sld [smem:[#allocation5 + $0x603]] }
  0x8f   :  { %v667_v50 = vstv %s1750_s14  ;;  %v674_v13 = vstv %s1755_s15  ;;  %v679_v32 = vsub.f32 %v1808_v55, %v678_v26  ;;  %v686_v35 = vstv %s1757_s20  ;;  %s1819_s14 = sld [smem:[#allocation2 + $0x700]]  ;;  %s1980_s20 = sld [smem:[#allocation7 + $0x681]] }
  0x90   :  { %1110 = vpow2.f32 %v493_v41  ;;  %v543_v58 = vmul.f32 1.442695, %v542_v42  ;;  %v559_v33 = vstv %s1759_s27  ;;  %v640_v53 = vstv %s1762_s5  ;;  %s1828_s5 = sld [smem:[#allocation5 + $0x683]]  ;;  %s1960_s15 = sld [smem:[#allocation7 + $0x600]] }
  0x91   :  { %v592_v60 = vmin.f32 %v584_v25, %v591_v59  ;;  %v626_v54 = vmin.f32 %v618_v24, %v625_v63  ;;  %v633_v56 = vmul.f32 %v632_v47, %v630_v46  ;;  %v713_v62 = vstv %s1766_s6  ;;  %s1835_s6 = sld [smem:[#allocation5 + $0x700]] }
  0x92   :  { %v668_v5 = vmul.f32 %v667_v50, %v665_v48  ;;  %v675_v9 = vmul.f32 %v674_v13, %v672_v49  ;;  %v687_v12 = vsub.f32 %v1824_v11, %v686_v35  ;;  %v714_v15 = vsub.f32 %v1773_v36, %v713_v62  ;;  %s1978_s27 = sld [smem:[#allocation7 + $0x680]] }
  0x93   :  { %v641_v18 = vmul.f32 %v640_v53, %v638_v17  ;;  %v680_v30 = vmul.f32 %v679_v32, %v679_v32  ;;  %v682_v19 = vstv %s1788_s19  ;;  %v720_v20 = vstv %s1790_s21  ;;  %s1847_s19 = sld [smem:[#allocation2 + $0x703]]  ;;  %s1855_s21 = sld [smem:[#allocation5 + $0x702]] }
  0x94   :  { %v715_v0 = vmul.f32 %v714_v15, %v714_v15  ;;  %v717_v1 = vstv %s1794_s22  ;;  %v721_v57 = vsub.f32 %v1779_v38, %v720_v20  ;;  %v728_v21 = vstv %s1796_s12  ;;  %s1867_s22 = sld [smem:[#allocation5 + $0x703]]  ;;  %s1883_s12 = sld [smem:[#allocation5 + $0x780]] }
  0x95   :  { %v634_v22 = vmin.f32 %v626_v54, %v633_v56  ;;  %v724_v27 = vstv %s1798_s18  ;;  %v729_v28 = vsub.f32 %v1808_v55, %v728_v21  ;;  %v736_v4 = vstv %s1800_s7  ;;  %s1888_s18 = sld [smem:[#allocation5 + $0x781]]  ;;  %s1896_s7 = sld [smem:[#allocation2 + $0x782]] }
  0x96   :  { %v676_v29 = vmin.f32 %v668_v5, %v675_v9  ;;  %v688_v31 = vmul.f32 %v687_v12, %v687_v12  ;;  %v722_v37 = vmul.f32 %v721_v57, %v721_v57  ;;  %v737_v6 = vsub.f32 %v1824_v11, %v736_v4 }
  0x97   :  { %v683_v41 = vmul.f32 %v682_v19, %v680_v30  ;;  %v718_v42 = vmul.f32 %v717_v1, %v715_v0  ;;  %v730_v25 = vmul.f32 %v729_v28, %v729_v28  ;;  %v732_v26 = vstv %s1812_s8  ;;  %s1921_s8 = sld [smem:[#allocation7 + $0x501]] }
  0x98   :  { %v1852_v59 = vadd.f32 %v1731_v51, %v1686_v16  ;;  %v593_v24 = vmul.f32 1.442695, %v592_v60  ;;  %v690_v63 = vstv %s1816_s11  ;;  %v725_v46 = vmul.f32 %v724_v27, %v722_v37  ;;  %s1923_s11 = sld [smem:[#allocation7 + $0x502]] }
  0x99   :  { %v448_v47 = vmul.f32 %v1731_v51, %v447_v40  ;;  %v642_v17 = vmin.f32 %v634_v22, %v641_v18  ;;  %v738_v48 = vmul.f32 %v737_v6, %v737_v6  ;;  %v763_v49 = vstv %s1819_s14  ;;  %s1947_s14 = sld [smem:[#allocation7 + $0x582]] }
  0x9a   :  { %v1861_v50 = vpop.eup %1110  ;;  %v452_v16 = vmul.f32 %v1731_v51, %v451_v43  ;;  %1112 = vpow2.f32 %v543_v58  ;;  %v733_v13 = vmul.f32 %v732_v26, %v730_v25  ;;  %v740_v32 = vstv %s1828_s5  ;;  %s1983_s5 = sld [smem:[#allocation7 + $0x682]] }
  0x9b   :  { %v684_v40 = vmin.f32 %v676_v29, %v683_v41  ;;  %v691_v35 = vmul.f32 %v690_v63, %v688_v31  ;;  %v726_v53 = vmin.f32 %v718_v42, %v725_v46  ;;  %v764_v60 = vsub.f32 %v1773_v36, %v763_v49 }
  0x9c   :  { %v456_v54 = vmul.f32 %v1731_v51, %v455_v45  ;;  %1114 = vpow2.f32 %v593_v24  ;;  %v767_v43 = vstv %s1835_s6  ;;  %v770_v58 = vstv %s1837_s0  ;;  %s1985_s6 = sld [smem:[#allocation7 + $0x683]]  ;;  %s1991_s0 = sld [smem:[#allocation7 + $0x700]] }
  0x9d   :  { %v643_v56 = vmul.f32 1.442695, %v642_v17  ;;  %v741_v62 = vmul.f32 %v740_v32, %v738_v48  ;;  %v765_v5 = vmul.f32 %v764_v60, %v764_v60  ;;  %v771_v9 = vsub.f32 %v1779_v38, %v770_v58 }
  0x9e   :  { %v734_v12 = vmin.f32 %v726_v53, %v733_v13  ;;  %v774_v15 = vstv %s1842_s16  ;;  %v778_v18 = vstv %s1845_s17  ;;  %v786_v30 = vstv %s1847_s19  ;;  %s1993_s16 = sld [smem:[#allocation7 + $0x701]]  ;;  %s1995_s17 = sld [smem:[#allocation7 + $0x702]] }
  0x9f   :  { %v692_v45 = vmin.f32 %v684_v40, %v691_v35  ;;  %v768_v19 = vmul.f32 %v767_v43, %v765_v5  ;;  %v772_v20 = vmul.f32 %v771_v9, %v771_v9  ;;  %v779_v0 = vsub.f32 %v1808_v55, %v778_v18  ;;  %s1997_s19 = sld [smem:[#allocation7 + $0x703]] }
  0xa0   :  { %v449_v1 = vadd.f32 %v448_v47, %v1724_v34  ;;  %v460_v57 = vmul.f32 %v1731_v51, %v459_v52  ;;  %v782_v21 = vstv %s1855_s21  ;;  %v787_v22 = vsub.f32 %v1824_v11, %v786_v30  ;;  %s2003_s21 = sld [smem:[#allocation7 + $0x780]] }
  0xa1   :  { %v453_v27 = vadd.f32 %v452_v16, %v1739_v61  ;;  %1116 = vpow2.f32 %v643_v56  ;;  %v775_v28 = vmul.f32 %v774_v15, %v772_v20  ;;  %v780_v4 = vmul.f32 %v779_v0, %v779_v0 }
  0xa2   :  { %v742_v29 = vmin.f32 %v734_v12, %v741_v62  ;;  %v788_v31 = vmul.f32 %v787_v22, %v787_v22  ;;  %v790_v34 = vstv %s1867_s22  ;;  %v813_v37 = vstv %s1869_s23  ;;  %s2005_s22 = sld [smem:[#allocation7 + $0x781]]  ;;  %s2007_s23 = sld [smem:[#allocation7 + $0x782]] }
  0xa3   :  { %v693_v52 = vmul.f32 1.442695, %v692_v45  ;;  %v776_v51 = vmin.f32 %v768_v19, %v775_v28  ;;  %v783_v6 = vmul.f32 %v782_v21, %v780_v4  ;;  %v814_v61 = vsub.f32 %v1773_v36, %v813_v37 }
  0xa4   :  { %v1113_v41 = vpop.eup %1112  ;;  %v457_v42 = vadd.f32 %v456_v54, %v1745_v10  ;;  %v461_v25 = vadd.f32 %v460_v57, %v1784_v39  ;;  %v495_v26 = vadd.f32 %v1861_v50, %v1852_v59  ;;  %v597_v24 = vstv %s1875_s24  ;;  %s2009_s24 = sld [smem:[#allocation7 + $0x783]] }
  0xa5   :  { %v498_v63 = vmul.f32 %v1861_v50, %v497_v2  ;;  %v784_v46 = vmin.f32 %v776_v51, %v783_v6  ;;  %v791_v47 = vmul.f32 %v790_v34, %v788_v31  ;;  %v815_v17 = vmul.f32 %v814_v61, %v814_v61 }
  0xa6   :  { %v1916_v36 = vpop.eup %1114  ;;  %v502_v10 = vmul.f32 %v1861_v50, %v501_v7  ;;  %v743_v39 = vmul.f32 1.442695, %v742_v29  ;;  %v817_v59 = vstv %s1883_s12  ;;  %v820_v48 = vstv %s1885_s25  ;;  %s1201_s12 = smov [#allocation8]  }
  0xa7   :  { %v506_v2 = vmul.f32 %v1861_v50, %v505_v8  ;;  %1118 = vpow2.f32 %v693_v52  ;;  %v792_v49 = vmin.f32 %v784_v46, %v791_v47  ;;  %v821_v16 = vsub.f32 %v1779_v38, %v820_v48  ;;  %s881_s25 = sshll.u32 %s1201_s12, 4  ;;  %s882_s25 = int_to_ptr.vmem [resolvable:$true] %s881_s25 }
  0xa8   :  { %v545_v13 = vadd.f32 %v1113_v41, %v495_v26  ;;  %v824_v7 = vstv %s1888_s18  ;;  %v828_v32 = vstv %s1896_s7  ;;  %v836_v40 = vstv %s1898_s13  ;;  %s1168_s18 = scalar_lea.vmem %s882_s25, 64  ;;  %p1173_p2 = scmp.lt.s32.totalorder %s882_s25, %s882_s25 }
  0xa9   :  { %v818_v35 = vmul.f32 %v817_v59, %v815_v17  ;;  %v822_v53 = vmul.f32 %v821_v16, %v821_v16  ;;  %v829_v60 = vsub.f32 %v1808_v55, %v828_v32  ;;  %v837_v54 = vsub.f32 %v1824_v11, %v836_v40  ;;  %p1169_p1 = scmp.ne.s32.totalorder %s882_s25, %s1168_s18  ;;  %p1174_p3 = scmp.lt.s32.totalorder %s1168_s18, %s1168_s18 }
  0xaa   :  { %v510_v8 = vmul.f32 %v1861_v50, %v509_v3  ;;  %1120 = vpow2.f32 %v743_v39  ;;  %v832_v38 = vstv %s1903_s1  ;;  %v840_v43 = vstv %s1905_s3 }
  0xab   :  { %v1117_v58 = vpop.eup %1116  ;;  %v793_v55 = vmul.f32 1.442695, %v792_v49  ;;  %v825_v56 = vmul.f32 %v824_v7, %v822_v53  ;;  %v830_v11 = vmul.f32 %v829_v60, %v829_v60  ;;  %v838_v62 = vmul.f32 %v837_v54, %v837_v54  ;;  %p1175_p4 = por %p1174_p3, %p1173_p2 }
  0xac   :  { %v499_v3 = vadd.f32 %v498_v63, %v449_v1  ;;  %v503_v50 = vadd.f32 %v502_v10, %v453_v27  ;;  %v548_v5 = vmul.f32 %v1113_v41, %v547_v14  ;;  %v595_v9 = vadd.f32 %v1916_v36, %v545_v13 }
  0xad   :  { %v552_v12 = vmul.f32 %v1113_v41, %v551_v23  ;;  %v826_v15 = vmin.f32 %v818_v35, %v825_v56  ;;  %v833_v18 = vmul.f32 %v832_v38, %v830_v11  ;;  %v841_v30 = vmul.f32 %v840_v43, %v838_v62  ;;  %p1176_p5 = pnand %p1175_p4, %p1169_p1 }
  0xae   :  { %v507_v45 = vadd.f32 %v506_v2, %v457_v42  ;;  %v556_v19 = vmul.f32 %v1113_v41, %v555_v44  ;;  %v601_v20 = vstv %s1921_s8  ;;  %v605_v0 = vstv %s1923_s11 }
  0xaf   :  { %v511_v1 = vadd.f32 %v510_v8, %v461_v25  ;;  %v560_v14 = vmul.f32 %v1113_v41, %v559_v33  ;;  %1122 = vpow2.f32 %v793_v55  ;;  %v834_v23 = vmin.f32 %v826_v15, %v833_v18 }
  0xb0   :  { %v549_v57 = vadd.f32 %v548_v5, %v499_v3  ;;  %v598_v21 = vmul.f32 %v1916_v36, %v597_v24  ;;  %v609_v44 = vstv %s1931_s2  ;;  %v645_v22 = vadd.f32 %v1117_v58, %v595_v9 }
  0xb1   :  { %v1119_v27 = vpop.eup %1118  ;;  %v553_v28 = vadd.f32 %v552_v12, %v503_v50  ;;  %v602_v33 = vmul.f32 %v1916_v36, %v601_v20  ;;  %v842_v4 = vmin.f32 %v834_v23, %v841_v30  ;;  %v557_v29 = vadd.f32 %v556_v19, %v507_v45 }
  0xb2   :  { %v606_v31 = vmul.f32 %v1916_v36, %v605_v0  ;;  %v647_v34 = vstv %s1941_s26  ;;  %v651_v37 = vstv %s1943_s28  ;;  %v561_v52 = vadd.f32 %v560_v14, %v511_v1 }
  0xb3   :  { %v610_v51 = vmul.f32 %v1916_v36, %v609_v44  ;;  %v655_v6 = vstv %s1947_s14  ;;  %v843_v61 = vmul.f32 1.442695, %v842_v4  ;;  %v599_v42 = vadd.f32 %v598_v21, %v549_v57 }
  0xb4   :  { %v1121_v41 = vpop.eup %1120  ;;  %v659_v25 = vstv %s1952_s30  ;;  %v695_v26 = vadd.f32 %v1119_v27, %v645_v22  ;;  %v603_v24 = vadd.f32 %v602_v33, %v553_v28  ;;  %v648_v63 = vmul.f32 %v1117_v58, %v647_v34 }
  0xb5   :  { %v652_v46 = vmul.f32 %v1117_v58, %v651_v37  ;;  %1124 = vpow2.f32 %v843_v61  ;;  %v607_v47 = vadd.f32 %v606_v31, %v557_v29  ;;  %v656_v17 = vmul.f32 %v1117_v58, %v655_v6 }
  0xb6   :  { %v697_v36 = vstv %s1960_s15  ;;  %v611_v10 = vadd.f32 %v610_v51, %v561_v52  ;;  %v660_v39 = vmul.f32 %v1117_v58, %v659_v25  ;;  %v701_v59 = vstv %s1964_s29 }
  0xb7   :  { %v705_v48 = vstv %s1966_s10  ;;  %v709_v2 = vstv %s1970_s9  ;;  %v745_v49 = vadd.f32 %v1121_v41, %v695_v26  ;;  %v649_v13 = vadd.f32 %v648_v63, %v599_v42 }
  0xb8   :  { %v653_v7 = vadd.f32 %v652_v46, %v603_v24  ;;  %v657_v32 = vadd.f32 %v656_v17, %v607_v47  ;;  %v698_v40 = vmul.f32 %v1119_v27, %v697_v36  ;;  %v702_v35 = vmul.f32 %v1119_v27, %v701_v59 }
  0xb9   :  { %v1123_v16 = vpop.eup %1122  ;;  %v706_v53 = vmul.f32 %v1119_v27, %v705_v48  ;;  %v661_v60 = vadd.f32 %v660_v39, %v611_v10  ;;  %v710_v54 = vmul.f32 %v1119_v27, %v709_v2  ;;  %v747_v8 = vstv %s1978_s27 }
  0xba   :  { %v751_v38 = vstv %s1980_s20  ;;  %v755_v43 = vstv %s1983_s5  ;;  %v759_v58 = vstv %s1985_s6  ;;  %v795_v55 = vadd.f32 %v1123_v16, %v745_v49 }
  0xbb   :  { %v699_v56 = vadd.f32 %v698_v40, %v649_v13  ;;  %v703_v11 = vadd.f32 %v702_v35, %v653_v7  ;;  %v707_v62 = vadd.f32 %v706_v53, %v657_v32  ;;  %v748_v3 = vmul.f32 %v1121_v41, %v747_v8 }
  0xbc   :  { %v711_v5 = vadd.f32 %v710_v54, %v661_v60  ;;  %v752_v9 = vmul.f32 %v1121_v41, %v751_v38  ;;  %v756_v12 = vmul.f32 %v1121_v41, %v755_v43  ;;  %v760_v15 = vmul.f32 %v1121_v41, %v759_v58 }
  0xbd   :  { %v797_v18 = vstv %s1991_s0  ;;  %v801_v45 = vstv %s1993_s16  ;;  %v805_v19 = vstv %s1995_s17  ;;  %v809_v20 = vstv %s1997_s19 }
  0xbe   :  { %v749_v0 = vadd.f32 %v748_v3, %v699_v56  ;;  %v753_v14 = vadd.f32 %v752_v9, %v703_v11  ;;  %v757_v23 = vadd.f32 %v756_v12, %v707_v62  ;;  %v761_v57 = vadd.f32 %v760_v15, %v711_v5 }
  0xbf   :  { %v1125_v50 = vpop.eup %1124  ;;  %v798_v21 = vmul.f32 %v1123_v16, %v797_v18  ;;  %v802_v44 = vmul.f32 %v1123_v16, %v801_v45  ;;  %v806_v22 = vmul.f32 %v1123_v16, %v805_v19  ;;  %v810_v27 = vmul.f32 %v1123_v16, %v809_v20 }
  0xc0   :  { %v845_v30 = vadd.f32 %v1125_v50, %v795_v55  ;;  %v847_v33 = vstv %s2003_s21  ;;  %v851_v4 = vstv %s2005_s22  ;;  %v855_v29 = vstv %s2007_s23 }
  0xc1   :  { %v859_v31 = vstv %s2009_s24  ;;  %v799_v34 = vadd.f32 %v798_v21, %v749_v0  ;;  %v803_v37 = vadd.f32 %v802_v44, %v753_v14  ;;  %v807_v52 = vadd.f32 %v806_v22, %v757_v23 }
  0xc2   :  { %v862_v1 = vmax.f32 %v845_v30, 1e-12  ;;  %v811_v51 = vadd.f32 %v810_v27, %v761_v57  ;;  %v848_v6 = vmul.f32 %v1125_v50, %v847_v33  ;;  %v852_v61 = vmul.f32 %v1125_v50, %v851_v4 }
  0xc3   :  { %v856_v41 = vmul.f32 %v1125_v50, %v855_v29  ;;  %v860_v42 = vmul.f32 %v1125_v50, %v859_v31 }
  0xc4   :  { %v863_v28 = vmin.f32 %v862_v1, 1e+12  ;;  %v849_v25 = vadd.f32 %v848_v6, %v799_v34  ;;  %v853_v26 = vadd.f32 %v852_v61, %v803_v37 }
  0xc5   :  { %v857_v24 = vadd.f32 %v856_v41, %v807_v52  ;;  %v861_v63 = vadd.f32 %v860_v42, %v811_v51 }
  0xc6   :  { %1126 = vrcp.f32 %v863_v28 }
  0xd0   :  { %v1127_v46 = vpop.eup %1126 }
  0xd1   :  { %v865_v47 = vmul.f32 %v1127_v46, %v849_v25  ;;  %v867_v17 = vmul.f32 %v1127_v46, %v853_v26  ;;  %v870_v36 = vmul.f32 %v1127_v46, %v857_v24  ;;  %v873_v10 = vmul.f32 %v1127_v46, %v861_v63 }
  0xd3   :  { %866 = vst [vmem:[#allocation8] sm:$0x1] %v865_v47  ;;  %869 = vst [vmem:[#allocation8 + $0x1] sm:$0x1] %v867_v17 }
  0xd4   :  { %872 = vst [vmem:[#allocation8 + $0x2] sm:$0x1] %v870_v36  ;;  %875 = vst [vmem:[#allocation8 + $0x3] sm:$0x1] %v873_v10 }
  0xd5   :  { %1179 = shalt.err (!%p1176_p5)
}
  0xd6   :  { %s1180_s1 = scalar_lea.hbm %s2035_s4, 64 }
  0xd7   :  { %p1181_p6 = scmp.ne.s32.totalorder %s2035_s4, %s1180_s1  ;;  %p1184_p7 = scmp.lt.u32.totalorder %s1180_s1, %s2035_s4 }
  0xd9   :  { %p1186_p8 = pnand %p1184_p7, %p1181_p6 }
  0xdb   :  { %1189 = shalt.err (!%p1186_p8)
}
  0xdc   :  { %s1202_s26 = smov 16   ;;  %s1203_s28 = smov 1  }
  0xdd   :  { %887 = dma.vmem_to_hbm [thread:$0]  %s882_s25, 64, %s2035_s4, [#allocation3], %s1202_s26, %s1202_s26, %s1203_s28  }
  0xde   :  { %1194 = dma.done.wait [#allocation3], 64  }
  0xdf   :  { %1195 = vsyncadd [#allocation3], 4294967232 }
  0xe0   :  { %891 = vsyncpa [#allocation3], 1 }
  0xe1   :  { %892 = vsyncpa [#allocation4], 1 }
  0xe2   :  { %893 = vsyncpa [#allocation6], 1 }

</bundles_post_ra>
